<compile_context>
chip_gen: v5e
topology: v5e:2x2
jax: 0.10.0
libtpu: 0.0.40
codegen_flags: <defaults>
</compile_context>

<pallas_src>
import functools
import math

import jax
import jax.numpy as jnp
from jax import lax
from jax.experimental import pallas as pl
from jax.experimental.pallas import tpu as pltpu


VMEM_LIMIT = 64 * 1024 * 1024  # explicit scoped-VMEM budget (default is 16/32 MiB)


# ----------------------------------------------------------------------------
# helpers
# ----------------------------------------------------------------------------
def _gelu_exact(x):
    # torch.nn.GELU(approximate='none')
    return 0.5 * x * (1.0 + lax.erf(x * (1.0 / math.sqrt(2.0))))


def _layernorm(x, g, b, eps):
    mu = jnp.mean(x, axis=-1, keepdims=True)
    xc = x - mu
    var = jnp.mean(xc * xc, axis=-1, keepdims=True)
    return (xc * lax.rsqrt(var + eps)) * g + b


def _round_up(x, m):
    return ((x + m - 1) // m) * m


def _nbytes(a):
    return int(a.size) * a.dtype.itemsize


def _row_tile(m, target=512):
    """Pick a row tile: full block if m <= target, else a 16-aligned divisor <= target,
    else pad m to a multiple of a 16-aligned target (never a single giant block)."""
    if m <= target:
        return m, m
    t = target - (target % 16)
    for cand in range(t, 15, -16):
        if m % cand == 0:
            return cand, m
    return t, _round_up(m, t)


def _q_tile(t_pad, target=256):
    """Query tile for the attention grid (t_pad is already a multiple of 16)."""
    if t_pad <= target:
        return t_pad
    for cand in range(target - (target % 16), 15, -16):
        if t_pad % cand == 0:
            return cand
    return 16


# ----------------------------------------------------------------------------
# Kernel 1: fused LayerNorm + matmul (QKV projections)
# ----------------------------------------------------------------------------
def _ln_matmul_kernel(x_ref, g_ref, b_ref, w_ref, bias_ref, o_ref, *, eps):
    x = x_ref[...].astype(jnp.float32)
    h = _layernorm(x, g_ref[...], b_ref[...], eps)
    acc = jnp.dot(h.astype(jnp.bfloat16), w_ref[...],
                  preferred_element_type=jnp.float32)
    o_ref[...] = (acc + bias_ref[...]).astype(o_ref.dtype)


def fused_ln_matmul(x, g, b, w, bias, *, eps=1e-5, out_dtype=jnp.bfloat16):
    """out = LayerNorm(x) @ w + bias.  LN stats f32, matmul operands bf16, f32 accumulate."""
    M, D = x.shape
    N = w.shape[1]
    tm, Mp = _row_tile(M)
    if Mp != M:
        x = jnp.pad(x, ((0, Mp - M), (0, 0)))
    flops = 2 * Mp * D * N + 8 * Mp * D
    bytes_acc = _nbytes(x) + _nbytes(w) + _nbytes(bias) + Mp * N * jnp.dtype(out_dtype).itemsize
    out = pl.pallas_call(
        functools.partial(_ln_matmul_kernel, eps=eps),
        grid=(Mp // tm,),
        in_specs=[
            pl.BlockSpec((tm, D), lambda i: (i, 0)),
            pl.BlockSpec((1, D), lambda i: (0, 0)),
            pl.BlockSpec((1, D), lambda i: (0, 0)),
            pl.BlockSpec((D, N), lambda i: (0, 0)),
            pl.BlockSpec((1, N), lambda i: (0, 0)),
        ],
        out_specs=pl.BlockSpec((tm, N), lambda i: (i, 0)),
        out_shape=jax.ShapeDtypeStruct((Mp, N), out_dtype),
        compiler_params=pltpu.CompilerParams(
            dimension_semantics=("parallel",), vmem_limit_bytes=VMEM_LIMIT),
        cost_estimate=pl.CostEstimate(flops=int(flops), transcendentals=int(Mp),
                                      bytes_accessed=int(bytes_acc)),
    )(x, g, b, w, bias)
    return out[:M] if Mp != M else out


# ----------------------------------------------------------------------------
# Kernel 2: fused attention + out-proj + residual + LayerNorm + MLP + residual
# ----------------------------------------------------------------------------
def _attn_mlp_kernel(q_ref, k_ref, v_ref, x_ref, wo_ref, bo_ref,
                     g2_ref, be2_ref, w1_ref, b1_ref, w2_ref, b2_ref, o_ref,
                     *, nhead, train_size, eps):
    q = q_ref[0]                               # (nhead, tq, dh)   bf16
    k = k_ref[0]                               # (nhead, S_pad, dh) bf16 (zero padded)
    v = v_ref[0]
    s_pad = k.shape[1]

    # head-batched QK^T: lane dim is S_pad (multiple of 128 -> lane dense)
    s = jnp.einsum("hqd,hkd->hqk", q, k, preferred_element_type=jnp.float32)
    if train_size < s_pad:                     # static: mask padded key columns
        col = lax.broadcasted_iota(jnp.int32, (1, 1, s_pad), 2)
        s = jnp.where(col < train_size, s, -1e30)
    m = jnp.max(s, axis=-1, keepdims=True)
    p = jnp.exp(s - m)                                            # f32 exp (EUP)
    denom = jnp.sum(p, axis=-1, keepdims=True)
    pv = jnp.einsum("hqk,hkd->hqd", p.astype(jnp.bfloat16), v,
                    preferred_element_type=jnp.float32)           # (nhead, tq, dh)
    pv = pv * pl.reciprocal(denom, approx=True)

    # output projection: per-head accumulation with leading-dim indexing only
    # (no 128-lane slicing, no concat); wo is pre-laid out as (nhead, dh, D).
    attn = None
    for h in range(nhead):
        part = jnp.dot(pv[h].astype(jnp.bfloat16), wo_ref[h],
                       preferred_element_type=jnp.float32)        # (tq, D)
        attn = part if attn is None else attn + part

    x = x_ref[0].astype(jnp.float32)                              # (tq, D)
    h1 = x + attn + bo_ref[...]                                   # residual 1

    # fused LayerNorm2 + MLP (Linear -> exact GELU -> Linear) + residual 2
    ln = _layernorm(h1, g2_ref[...], be2_ref[...], eps)
    f = jnp.dot(ln.astype(jnp.bfloat16), w1_ref[...],
                preferred_element_type=jnp.float32) + b1_ref[...]
    f = _gelu_exact(f)
    out = h1 + jnp.dot(f.astype(jnp.bfloat16), w2_ref[...],
                       preferred_element_type=jnp.float32) + b2_ref[...]
    o_ref[0] = out.astype(o_ref.dtype)


def attention_mlp_block(q, k, v, x, wo3, bo, g2, be2, w1, b1, w2, b2,
                        *, nhead, train_size, tq, eps=1e-5):
    """x_new = MLPBlock(AttnBlock(x));  q:(B,H,T,dh), k/v:(B,H,S_pad,dh), x:(B,T,D) bf16."""
    B, nh, T_pad, dh = q.shape
    S_pad = k.shape[2]
    D = x.shape[-1]
    F = w1.shape[1]
    nq = T_pad // tq

    flops = 2 * B * T_pad * D * (2 * S_pad + D + 2 * F)
    transc = B * T_pad * (nh * S_pad + F)
    bytes_acc = (_nbytes(q) + 2 * _nbytes(x) + nq * (_nbytes(k) + _nbytes(v))
                 + _nbytes(wo3) + _nbytes(w1) + _nbytes(w2))

    # TODO(synk): constant-index weight specs could be single-buffered
    # (pipeline_mode=pl.Buffered(1)) to halve their VMEM footprint on v7x.
    return pl.pallas_call(
        functools.partial(_attn_mlp_kernel, nhead=nhead,
                          train_size=train_size, eps=eps),
        grid=(B, nq),
        in_specs=[
            pl.BlockSpec((1, nh, tq, dh), lambda b, qi: (b, 0, qi, 0)),     # q
            pl.BlockSpec((1, nh, S_pad, dh), lambda b, qi: (b, 0, 0, 0)),   # k
            pl.BlockSpec((1, nh, S_pad, dh), lambda b, qi: (b, 0, 0, 0)),   # v
            pl.BlockSpec((1, tq, D), lambda b, qi: (b, qi, 0)),             # x (residual)
            pl.BlockSpec((nh, dh, D), lambda b, qi: (0, 0, 0)),             # wo (per-head)
            pl.BlockSpec((1, D), lambda b, qi: (0, 0)),                     # bo
            pl.BlockSpec((1, D), lambda b, qi: (0, 0)),                     # ln2 gamma
            pl.BlockSpec((1, D), lambda b, qi: (0, 0)),                     # ln2 beta
            pl.BlockSpec((D, F), lambda b, qi: (0, 0)),                     # w1
            pl.BlockSpec((1, F), lambda b, qi: (0, 0)),                     # b1
            pl.BlockSpec((F, D), lambda b, qi: (0, 0)),                     # w2
            pl.BlockSpec((1, D), lambda b, qi: (0, 0)),                     # b2
        ],
        out_specs=pl.BlockSpec((1, tq, D), lambda b, qi: (b, qi, 0)),
        out_shape=jax.ShapeDtypeStruct((B, T_pad, D), jnp.bfloat16),
        compiler_params=pltpu.CompilerParams(
            dimension_semantics=("parallel", "parallel"),
            vmem_limit_bytes=VMEM_LIMIT),
        cost_estimate=pl.CostEstimate(flops=int(flops), transcendentals=int(transc),
                                      bytes_accessed=int(bytes_acc)),
    )(q, k, v, x, wo3, bo, g2, be2, w1, b1, w2, b2)


# ----------------------------------------------------------------------------
# Kernel 3: fused LayerNorm + MLP (final LN + decoder, test rows only)
# ----------------------------------------------------------------------------
def _ln_mlp_kernel(x_ref, g_ref, b_ref, w1_ref, b1_ref, w2_ref, b2_ref, o_ref, *, eps):
    x = x_ref[...].astype(jnp.float32)
    h = _layernorm(x, g_ref[...], b_ref[...], eps)
    f = jnp.dot(h.astype(jnp.bfloat16), w1_ref[...],
                preferred_element_type=jnp.float32)
    f = _gelu_exact(f + b1_ref[...])
    out = jnp.dot(f.astype(jnp.bfloat16), w2_ref[...],
                  preferred_element_type=jnp.float32) + b2_ref[...]
    o_ref[...] = out


def fused_ln_mlp(x, g, b, w1, b1, w2, b2, *, eps=1e-5):
    """out = GELU(LayerNorm(x) @ w1 + b1) @ w2 + b2   (f32 output)."""
    M, D = x.shape
    F = w1.shape[1]
    N = w2.shape[1]
    tm, Mp = _row_tile(M)
    if Mp != M:
        x = jnp.pad(x, ((0, Mp - M), (0, 0)))
    flops = 2 * Mp * (D * F + F * N) + 10 * Mp * (D + F)
    bytes_acc = _nbytes(x) + _nbytes(w1) + _nbytes(w2) + Mp * N * 4
    out = pl.pallas_call(
        functools.partial(_ln_mlp_kernel, eps=eps),
        grid=(Mp // tm,),
        in_specs=[
            pl.BlockSpec((tm, D), lambda i: (i, 0)),
            pl.BlockSpec((1, D), lambda i: (0, 0)),
            pl.BlockSpec((1, D), lambda i: (0, 0)),
            pl.BlockSpec((D, F), lambda i: (0, 0)),
            pl.BlockSpec((1, F), lambda i: (0, 0)),
            pl.BlockSpec((F, N), lambda i: (0, 0)),
            pl.BlockSpec((1, N), lambda i: (0, 0)),
        ],
        out_specs=pl.BlockSpec((tm, N), lambda i: (i, 0)),
        out_shape=jax.ShapeDtypeStruct((Mp, N), jnp.float32),
        compiler_params=pltpu.CompilerParams(
            dimension_semantics=("parallel",), vmem_limit_bytes=VMEM_LIMIT),
        cost_estimate=pl.CostEstimate(flops=int(flops), transcendentals=int(Mp * (F + 1)),
                                      bytes_accessed=int(bytes_acc)),
    )(x, g, b, w1, b1, w2, b2)
    return out[:M] if Mp != M else out


# ----------------------------------------------------------------------------
# Parameters (deterministic synthetic init; shapes from ICLearning.__init__)
# ----------------------------------------------------------------------------
def init_params(key, max_classes, d_model, num_blocks, nhead, dim_feedforward):
    del nhead

    def dense(k, fan_in, fan_out):
        return 0.02 * jax.random.normal(k, (fan_in, fan_out), jnp.float32)

    keys = jax.random.split(key, 4 + 8 * num_blocks)
    it = iter(range(len(keys)))

    params = {
        "y_enc": {  # OneHotAndLinear(max_classes, d_model)
            "w": dense(keys[next(it)], max_classes, d_model),
            "b": jnp.zeros((d_model,), jnp.float32),
        },
        "ln_g": jnp.ones((d_model,), jnp.float32),   # self.ln (norm_first=True)
        "ln_b": jnp.zeros((d_model,), jnp.float32),
        "dec1_w": dense(keys[next(it)], d_model, 2 * d_model),
        "dec1_b": jnp.zeros((2 * d_model,), jnp.float32),
        "dec2_w": dense(keys[next(it)], 2 * d_model, max_classes),
        "dec2_b": jnp.zeros((max_classes,), jnp.float32),
        "blocks": [],
    }
    for _ in range(num_blocks):
        blk = {
            "ln1_g": jnp.ones((d_model,), jnp.float32),
            "ln1_b": jnp.zeros((d_model,), jnp.float32),
            "wq": dense(keys[next(it)], d_model, d_model),
            "bq": jnp.zeros((d_model,), jnp.float32),
            "wk": dense(keys[next(it)], d_model, d_model),
            "bk": jnp.zeros((d_model,), jnp.float32),
            "wv": dense(keys[next(it)], d_model, d_model),
            "bv": jnp.zeros((d_model,), jnp.float32),
            "wo": dense(keys[next(it)], d_model, d_model),
            "bo": jnp.zeros((d_model,), jnp.float32),
            "ln2_g": jnp.ones((d_model,), jnp.float32),
            "ln2_b": jnp.zeros((d_model,), jnp.float32),
            "w1": dense(keys[next(it)], d_model, dim_feedforward),
            "b1": jnp.zeros((dim_feedforward,), jnp.float32),
            "w2": dense(keys[next(it)], dim_feedforward, d_model),
            "b2": jnp.zeros((d_model,), jnp.float32),
        }
        params["blocks"].append(blk)
    return params


def prepare_params(raw, *, max_classes, d_model, nhead):
    """One-time conversion to kernel-ready dtypes/layouts: bf16 weights, folded 1/sqrt(dh)
    into wq/bq, split Q vs fused KV projections, per-head (nhead, dh, D) wo layout,
    lane-padded decoder head, (1, N) f32 biases."""
    dh = d_model // nhead
    scale = 1.0 / math.sqrt(dh)
    n_pad = max(128, _round_up(max_classes, 128))

    def row(v):
        return v.reshape(1, -1).astype(jnp.float32)

    p = {
        "y_enc_w": raw["y_enc"]["w"].astype(jnp.float32),   # (C, D) embedding table
        "y_enc_b": raw["y_enc"]["b"].astype(jnp.float32),
        "ln_g": row(raw["ln_g"]),
        "ln_b": row(raw["ln_b"]),
        "dec1_w": raw["dec1_w"].astype(jnp.bfloat16),
        "dec1_b": row(raw["dec1_b"]),
        "dec2_w": jnp.zeros((2 * d_model, n_pad), jnp.bfloat16)
                     .at[:, :max_classes].set(raw["dec2_w"].astype(jnp.bfloat16)),
        "dec2_b": jnp.zeros((1, n_pad), jnp.float32)
                     .at[0, :max_classes].set(raw["dec2_b"].astype(jnp.float32)),
        "blocks": [],
    }
    for blk in raw["blocks"]:
        p["blocks"].append({
            "ln1_g": row(blk["ln1_g"]), "ln1_b": row(blk["ln1_b"]),
            "wq": (blk["wq"] * scale).astype(jnp.bfloat16),
            "bq": row(blk["bq"] * scale),
            "wkv": jnp.concatenate([blk["wk"], blk["wv"]], axis=1).astype(jnp.bfloat16),
            "bkv": jnp.concatenate([blk["bk"], blk["bv"]]).reshape(1, -1).astype(jnp.float32),
            "wo3": blk["wo"].reshape(nhead, dh, d_model).astype(jnp.bfloat16),
            "bo": row(blk["bo"]),
            "ln2_g": row(blk["ln2_g"]), "ln2_b": row(blk["ln2_b"]),
            "w1": blk["w1"].astype(jnp.bfloat16), "b1": row(blk["b1"]),
            "w2": blk["w2"].astype(jnp.bfloat16), "b2": row(blk["b2"]),
        })
    return p


# ----------------------------------------------------------------------------
# ICLearning forward (training mode): _icl_predictions + slice test rows
# ----------------------------------------------------------------------------
def icl_forward(params, R, y_train, *, max_classes, nhead):
    B, T, D = R.shape
    train_size = y_train.shape[1]
    t_test = T - train_size
    dh = D // nhead

    T_pad = _round_up(T, 16)                        # sublane-friendly row count
    S_pad = max(128, _round_up(train_size, 128))    # lane-dense key length
    tq = _q_tile(T_pad)

    # y_encoder: one-hot(max_classes) @ W + b  ==  embedding-row gather + bias
    y_emb = jnp.take(params["y_enc_w"], y_train, axis=0) + params["y_enc_b"]
    x = jnp.pad(R.astype(jnp.float32), ((0, 0), (0, T_pad - T), (0, 0)))
    x = x.at[:, :train_size].add(y_emb).astype(jnp.bfloat16)   # bf16 residual stream

    for blk in params["blocks"]:
        # Q over all rows; K/V over the first train_size rows only
        q = fused_ln_matmul(x.reshape(B * T_pad, D), blk["ln1_g"], blk["ln1_b"],
                            blk["wq"], blk["bq"])
        kv = fused_ln_matmul(x[:, :train_size].reshape(B * train_size, D),
                             blk["ln1_g"], blk["ln1_b"], blk["wkv"], blk["bkv"])

        # head-major layouts (cheap XLA transposes on bf16, keeps the kernel lane-dense)
        q = q.reshape(B, T_pad, nhead, dh).transpose(0, 2, 1, 3)          # (B,H,T,dh)
        kv = kv.reshape(B, train_size, 2, nhead, dh).transpose(2, 0, 3, 1, 4)
        pad = ((0, 0), (0, 0), (0, S_pad - train_size), (0, 0))
        k = jnp.pad(kv[0], pad)                                           # (B,H,S_pad,dh)
        v = jnp.pad(kv[1], pad)

        # fused attention (train-size keys) + out-proj + residual + LN2 + MLP + residual
        x = attention_mlp_block(q, k, v, x, blk["wo3"], blk["bo"],
                                blk["ln2_g"], blk["ln2_b"],
                                blk["w1"], blk["b1"], blk["w2"], blk["b2"],
                                nhead=nhead, train_size=train_size, tq=tq)

    # training mode keeps test-row logits only -> run final LN + decoder on test rows;
    # decoder output is lane-padded to 128, slice classes afterwards.
    x_test = x[:, train_size:T].reshape(B * t_test, D)
    out = fused_ln_mlp(x_test, params["ln_g"], params["ln_b"],
                       params["dec1_w"], params["dec1_b"],
                       params["dec2_w"], params["dec2_b"])
    return out[:, :max_classes].reshape(B, t_test, max_classes)


# TODO(synk): inference-mode hierarchical classification (_predict_hierarchical /
# InferenceManager auto-batching) uses data-dependent Python recursion and
# boolean-mask gathers; only the training-mode forward is implemented here.

if __name__ == "__main__":
    max_classes = 10
    d_model = 32
    num_blocks = 2
    nhead = 4
    dim_feedforward = 64

    B, T, train_size = 2, 8, 5

    key = jax.random.PRNGKey(0)
    k_params, k_R, k_y = jax.random.split(key, 3)

    raw = init_params(k_params, max_classes, d_model, num_blocks, nhead, dim_feedforward)
    params = prepare_params(raw, max_classes=max_classes, d_model=d_model, nhead=nhead)
    R = jax.random.normal(k_R, (B, T, d_model), jnp.float32)
    y_train = jax.random.randint(k_y, (B, train_size), 0, max_classes)

    fwd = jax.jit(functools.partial(icl_forward, max_classes=max_classes, nhead=nhead))
    out = jax.block_until_ready(fwd(params, R, y_train))

    assert out.shape == (B, T - train_size, max_classes), out.shape
    assert bool(jnp.all(jnp.isfinite(out)))
    print("KERNEL_OK")
</pallas_src>

<mosaic_0001>
module attributes {stable_mosaic.version = 11 : i64} {
  func.func @_ln_matmul_kernel(%arg0: i32, %arg1: memref<10x32xbf16, #tpu.memory_space<vmem>>, %arg2: memref<1x32xf32, #tpu.memory_space<vmem>>, %arg3: memref<1x32xf32, #tpu.memory_space<vmem>>, %arg4: memref<32x64xbf16, #tpu.memory_space<vmem>>, %arg5: memref<1x64xf32, #tpu.memory_space<vmem>>, %arg6: memref<10x64xbf16, #tpu.memory_space<vmem>>) attributes {dimension_semantics = [#tpu.dimension_semantics<parallel>], iteration_bounds = array<i64: 1>, scalar_prefetch = 0 : i64, scratch_operands = 0 : i64, tpu.core_type = #tpu.core_type<tc>, window_params = [{transform_indices = @transform_0, window_bounds = array<i64: 10, 32>}, {pipeline_mode = #tpu.pipeline_mode<synchronous>, transform_indices = @transform_1, window_bounds = array<i64: 1, 32>}, {pipeline_mode = #tpu.pipeline_mode<synchronous>, transform_indices = @transform_2, window_bounds = array<i64: 1, 32>}, {pipeline_mode = #tpu.pipeline_mode<synchronous>, transform_indices = @transform_3, window_bounds = array<i64: 32, 64>}, {pipeline_mode = #tpu.pipeline_mode<synchronous>, transform_indices = @transform_4, window_bounds = array<i64: 1, 64>}, {transform_indices = @transform_5, window_bounds = array<i64: 10, 64>}]} {
    %c0 = arith.constant 0 : index
    %c0_0 = arith.constant 0 : index
    %0 = vector.load %arg1[%c0, %c0_0] : memref<10x32xbf16, #tpu.memory_space<vmem>>, vector<10x32xbf16>
    %1 = arith.extf %0 : vector<10x32xbf16> to vector<10x32xf32>
    %c0_1 = arith.constant 0 : index
    %c0_2 = arith.constant 0 : index
    %2 = vector.load %arg2[%c0_1, %c0_2] : memref<1x32xf32, #tpu.memory_space<vmem>>, vector<1x32xf32>
    %c0_3 = arith.constant 0 : index
    %c0_4 = arith.constant 0 : index
    %3 = vector.load %arg3[%c0_3, %c0_4] : memref<1x32xf32, #tpu.memory_space<vmem>>, vector<1x32xf32>
    %cst = arith.constant dense<0.000000e+00> : vector<10xf32>
    %4 = vector.multi_reduction <add>, %1, %cst [1] : vector<10x32xf32> to vector<10xf32>
    %5 = vector.shape_cast %4 : vector<10xf32> to vector<10x1xf32>
    %cst_5 = arith.constant 3.200000e+01 : f32
    %6 = vector.broadcast %cst_5 : f32 to vector<10x1xf32>
    %7 = arith.divf %5, %6 : vector<10x1xf32>
    %8 = vector.broadcast %7 : vector<10x1xf32> to vector<10x32xf32>
    %9 = arith.subf %1, %8 : vector<10x32xf32>
    %10 = arith.mulf %9, %9 : vector<10x32xf32>
    %cst_6 = arith.constant dense<0.000000e+00> : vector<10xf32>
    %11 = vector.multi_reduction <add>, %10, %cst_6 [1] : vector<10x32xf32> to vector<10xf32>
    %12 = vector.shape_cast %11 : vector<10xf32> to vector<10x1xf32>
    %cst_7 = arith.constant 3.200000e+01 : f32
    %13 = vector.broadcast %cst_7 : f32 to vector<10x1xf32>
    %14 = arith.divf %12, %13 : vector<10x1xf32>
    %cst_8 = arith.constant 9.99999974E-6 : f32
    %15 = vector.broadcast %cst_8 : f32 to vector<10x1xf32>
    %16 = arith.addf %14, %15 : vector<10x1xf32>
    %17 = math.rsqrt %16 : vector<10x1xf32>
    %18 = vector.broadcast %17 : vector<10x1xf32> to vector<10x32xf32>
    %19 = arith.mulf %9, %18 : vector<10x32xf32>
    %20 = vector.broadcast %2 : vector<1x32xf32> to vector<10x32xf32>
    %21 = arith.mulf %19, %20 : vector<10x32xf32>
    %22 = vector.broadcast %3 : vector<1x32xf32> to vector<10x32xf32>
    %23 = arith.addf %21, %22 : vector<10x32xf32>
    %24 = arith.truncf %23 : vector<10x32xf32> to vector<10x32xbf16>
    %c0_9 = arith.constant 0 : index
    %c0_10 = arith.constant 0 : index
    %25 = vector.load %arg4[%c0_9, %c0_10] : memref<32x64xbf16, #tpu.memory_space<vmem>>, vector<32x64xbf16>
    %cst_11 = arith.constant dense<0.000000e+00> : vector<10x64xf32>
    %26 = tpu.matmul %24, %25, %cst_11 {dimension_numbers = #tpu.dot_dimension_numbers<[1], [0], [0], [1], [0, 0, 1, 1], [], []>} : vector<10x32xbf16>, vector<32x64xbf16>, vector<10x64xf32> -> vector<10x64xf32>
    %c0_12 = arith.constant 0 : index
    %c0_13 = arith.constant 0 : index
    %27 = vector.load %arg5[%c0_12, %c0_13] : memref<1x64xf32, #tpu.memory_space<vmem>>, vector<1x64xf32>
    %28 = vector.broadcast %27 : vector<1x64xf32> to vector<10x64xf32>
    %29 = arith.addf %26, %28 : vector<10x64xf32>
    %30 = arith.truncf %29 : vector<10x64xf32> to vector<10x64xbf16>
    %c0_14 = arith.constant 0 : index
    %c0_15 = arith.constant 0 : index
    %31 = vector.load %arg6[%c0_14, %c0_15] : memref<10x64xbf16, #tpu.memory_space<vmem>>, vector<10x64xbf16>
    tpu.vector_store %arg6[%c0_14, %c0_15], %30 {strides = array<i32>} : memref<10x64xbf16, #tpu.memory_space<vmem>>, vector<10x64xbf16>,
    return
  }
  func.func @transform_0(%arg0: i32) -> (i32, i32) {
    %c0_i32 = arith.constant 0 : i32
    %c0_i32_0 = arith.constant 0 : i32
    return %arg0, %c0_i32 : i32, i32
  }
  func.func @transform_1(%arg0: i32) -> (i32, i32) {
    %c0_i32 = arith.constant 0 : i32
    %c0_i32_0 = arith.constant 0 : i32
    %c0_i32_1 = arith.constant 0 : i32
    return %c0_i32, %c0_i32_0 : i32, i32
  }
  func.func @transform_2(%arg0: i32) -> (i32, i32) {
    %c0_i32 = arith.constant 0 : i32
    %c0_i32_0 = arith.constant 0 : i32
    %c0_i32_1 = arith.constant 0 : i32
    return %c0_i32, %c0_i32_0 : i32, i32
  }
  func.func @transform_3(%arg0: i32) -> (i32, i32) {
    %c0_i32 = arith.constant 0 : i32
    %c0_i32_0 = arith.constant 0 : i32
    %c0_i32_1 = arith.constant 0 : i32
    return %c0_i32, %c0_i32_0 : i32, i32
  }
  func.func @transform_4(%arg0: i32) -> (i32, i32) {
    %c0_i32 = arith.constant 0 : i32
    %c0_i32_0 = arith.constant 0 : i32
    %c0_i32_1 = arith.constant 0 : i32
    return %c0_i32, %c0_i32_0 : i32, i32
  }
  func.func @transform_5(%arg0: i32) -> (i32, i32) {
    %c0_i32 = arith.constant 0 : i32
    %c0_i32_0 = arith.constant 0 : i32
    return %arg0, %c0_i32 : i32, i32
  }
}

module attributes {stable_mosaic.version = 11 : i64} {
  func.func @_ln_matmul_kernel(%arg0: i32, %arg1: memref<32x32xbf16, #tpu.memory_space<vmem>>, %arg2: memref<1x32xf32, #tpu.memory_space<vmem>>, %arg3: memref<1x32xf32, #tpu.memory_space<vmem>>, %arg4: memref<32x32xbf16, #tpu.memory_space<vmem>>, %arg5: memref<1x32xf32, #tpu.memory_space<vmem>>, %arg6: memref<32x32xbf16, #tpu.memory_space<vmem>>) attributes {dimension_semantics = [#tpu.dimension_semantics<parallel>], iteration_bounds = array<i64: 1>, scalar_prefetch = 0 : i64, scratch_operands = 0 : i64, tpu.core_type = #tpu.core_type<tc>, window_params = [{transform_indices = @transform_0, window_bounds = array<i64: 32, 32>}, {pipeline_mode = #tpu.pipeline_mode<synchronous>, transform_indices = @transform_1, window_bounds = array<i64: 1, 32>}, {pipeline_mode = #tpu.pipeline_mode<synchronous>, transform_indices = @transform_2, window_bounds = array<i64: 1, 32>}, {pipeline_mode = #tpu.pipeline_mode<synchronous>, transform_indices = @transform_3, window_bounds = array<i64: 32, 32>}, {pipeline_mode = #tpu.pipeline_mode<synchronous>, transform_indices = @transform_4, window_bounds = array<i64: 1, 32>}, {transform_indices = @transform_5, window_bounds = array<i64: 32, 32>}]} {
    %c0 = arith.constant 0 : index
    %c0_0 = arith.constant 0 : index
    %0 = vector.load %arg1[%c0, %c0_0] : memref<32x32xbf16, #tpu.memory_space<vmem>>, vector<32x32xbf16>
    %1 = arith.extf %0 : vector<32x32xbf16> to vector<32x32xf32>
    %c0_1 = arith.constant 0 : index
    %c0_2 = arith.constant 0 : index
    %2 = vector.load %arg2[%c0_1, %c0_2] : memref<1x32xf32, #tpu.memory_space<vmem>>, vector<1x32xf32>
    %c0_3 = arith.constant 0 : index
    %c0_4 = arith.constant 0 : index
    %3 = vector.load %arg3[%c0_3, %c0_4] : memref<1x32xf32, #tpu.memory_space<vmem>>, vector<1x32xf32>
    %cst = arith.constant dense<0.000000e+00> : vector<32xf32>
    %4 = vector.multi_reduction <add>, %1, %cst [1] : vector<32x32xf32> to vector<32xf32>
    %5 = vector.shape_cast %4 : vector<32xf32> to vector<32x1xf32>
    %cst_5 = arith.constant 3.200000e+01 : f32
    %6 = vector.broadcast %cst_5 : f32 to vector<32x1xf32>
    %7 = arith.divf %5, %6 : vector<32x1xf32>
    %8 = vector.broadcast %7 : vector<32x1xf32> to vector<32x32xf32>
    %9 = arith.subf %1, %8 : vector<32x32xf32>
    %10 = arith.mulf %9, %9 : vector<32x32xf32>
    %cst_6 = arith.constant dense<0.000000e+00> : vector<32xf32>
    %11 = vector.multi_reduction <add>, %10, %cst_6 [1] : vector<32x32xf32> to vector<32xf32>
    %12 = vector.shape_cast %11 : vector<32xf32> to vector<32x1xf32>
    %cst_7 = arith.constant 3.200000e+01 : f32
    %13 = vector.broadcast %cst_7 : f32 to vector<32x1xf32>
    %14 = arith.divf %12, %13 : vector<32x1xf32>
    %cst_8 = arith.constant 9.99999974E-6 : f32
    %15 = vector.broadcast %cst_8 : f32 to vector<32x1xf32>
    %16 = arith.addf %14, %15 : vector<32x1xf32>
    %17 = math.rsqrt %16 : vector<32x1xf32>
    %18 = vector.broadcast %17 : vector<32x1xf32> to vector<32x32xf32>
    %19 = arith.mulf %9, %18 : vector<32x32xf32>
    %20 = vector.broadcast %2 : vector<1x32xf32> to vector<32x32xf32>
    %21 = arith.mulf %19, %20 : vector<32x32xf32>
    %22 = vector.broadcast %3 : vector<1x32xf32> to vector<32x32xf32>
    %23 = arith.addf %21, %22 : vector<32x32xf32>
    %24 = arith.truncf %23 : vector<32x32xf32> to vector<32x32xbf16>
    %c0_9 = arith.constant 0 : index
    %c0_10 = arith.constant 0 : index
    %25 = vector.load %arg4[%c0_9, %c0_10] : memref<32x32xbf16, #tpu.memory_space<vmem>>, vector<32x32xbf16>
    %cst_11 = arith.constant dense<0.000000e+00> : vector<32x32xf32>
    %26 = tpu.matmul %24, %25, %cst_11 {dimension_numbers = #tpu.dot_dimension_numbers<[1], [0], [0], [1], [0, 0, 1, 1], [], []>} : vector<32x32xbf16>, vector<32x32xbf16>, vector<32x32xf32> -> vector<32x32xf32>
    %c0_12 = arith.constant 0 : index
    %c0_13 = arith.constant 0 : index
    %27 = vector.load %arg5[%c0_12, %c0_13] : memref<1x32xf32, #tpu.memory_space<vmem>>, vector<1x32xf32>
    %28 = vector.broadcast %27 : vector<1x32xf32> to vector<32x32xf32>
    %29 = arith.addf %26, %28 : vector<32x32xf32>
    %30 = arith.truncf %29 : vector<32x32xf32> to vector<32x32xbf16>
    %c0_14 = arith.constant 0 : index
    %c0_15 = arith.constant 0 : index
    %31 = vector.load %arg6[%c0_14, %c0_15] : memref<32x32xbf16, #tpu.memory_space<vmem>>, vector<32x32xbf16>
    tpu.vector_store %arg6[%c0_14, %c0_15], %30 {strides = array<i32>} : memref<32x32xbf16, #tpu.memory_space<vmem>>, vector<32x32xbf16>,
    return
  }
  func.func @transform_0(%arg0: i32) -> (i32, i32) {
    %c0_i32 = arith.constant 0 : i32
    %c0_i32_0 = arith.constant 0 : i32
    return %arg0, %c0_i32 : i32, i32
  }
  func.func @transform_1(%arg0: i32) -> (i32, i32) {
    %c0_i32 = arith.constant 0 : i32
    %c0_i32_0 = arith.constant 0 : i32
    %c0_i32_1 = arith.constant 0 : i32
    return %c0_i32, %c0_i32_0 : i32, i32
  }
  func.func @transform_2(%arg0: i32) -> (i32, i32) {
    %c0_i32 = arith.constant 0 : i32
    %c0_i32_0 = arith.constant 0 : i32
    %c0_i32_1 = arith.constant 0 : i32
    return %c0_i32, %c0_i32_0 : i32, i32
  }
  func.func @transform_3(%arg0: i32) -> (i32, i32) {
    %c0_i32 = arith.constant 0 : i32
    %c0_i32_0 = arith.constant 0 : i32
    %c0_i32_1 = arith.constant 0 : i32
    return %c0_i32, %c0_i32_0 : i32, i32
  }
  func.func @transform_4(%arg0: i32) -> (i32, i32) {
    %c0_i32 = arith.constant 0 : i32
    %c0_i32_0 = arith.constant 0 : i32
    %c0_i32_1 = arith.constant 0 : i32
    return %c0_i32, %c0_i32_0 : i32, i32
  }
  func.func @transform_5(%arg0: i32) -> (i32, i32) {
    %c0_i32 = arith.constant 0 : i32
    %c0_i32_0 = arith.constant 0 : i32
    return %arg0, %c0_i32 : i32, i32
  }
}

module attributes {stable_mosaic.version = 11 : i64} {
  func.func @_ln_mlp_kernel(%arg0: i32, %arg1: memref<6x32xbf16, #tpu.memory_space<vmem>>, %arg2: memref<1x32xf32, #tpu.memory_space<vmem>>, %arg3: memref<1x32xf32, #tpu.memory_space<vmem>>, %arg4: memref<32x64xbf16, #tpu.memory_space<vmem>>, %arg5: memref<1x64xf32, #tpu.memory_space<vmem>>, %arg6: memref<64x128xbf16, #tpu.memory_space<vmem>>, %arg7: memref<1x128xf32, #tpu.memory_space<vmem>>, %arg8: memref<6x128xf32, #tpu.memory_space<vmem>>) attributes {dimension_semantics = [#tpu.dimension_semantics<parallel>], iteration_bounds = array<i64: 1>, scalar_prefetch = 0 : i64, scratch_operands = 0 : i64, tpu.core_type = #tpu.core_type<tc>, window_params = [{transform_indices = @transform_0, window_bounds = array<i64: 6, 32>}, {pipeline_mode = #tpu.pipeline_mode<synchronous>, transform_indices = @transform_1, window_bounds = array<i64: 1, 32>}, {pipeline_mode = #tpu.pipeline_mode<synchronous>, transform_indices = @transform_2, window_bounds = array<i64: 1, 32>}, {pipeline_mode = #tpu.pipeline_mode<synchronous>, transform_indices = @transform_3, window_bounds = array<i64: 32, 64>}, {pipeline_mode = #tpu.pipeline_mode<synchronous>, transform_indices = @transform_4, window_bounds = array<i64: 1, 64>}, {pipeline_mode = #tpu.pipeline_mode<synchronous>, transform_indices = @transform_5, window_bounds = array<i64: 64, 128>}, {pipeline_mode = #tpu.pipeline_mode<synchronous>, transform_indices = @transform_6, window_bounds = array<i64: 1, 128>}, {transform_indices = @transform_7, window_bounds = array<i64: 6, 128>}]} {
    %c0 = arith.constant 0 : index
    %c0_0 = arith.constant 0 : index
    %0 = vector.load %arg1[%c0, %c0_0] : memref<6x32xbf16, #tpu.memory_space<vmem>>, vector<6x32xbf16>
    %1 = arith.extf %0 : vector<6x32xbf16> to vector<6x32xf32>
    %c0_1 = arith.constant 0 : index
    %c0_2 = arith.constant 0 : index
    %2 = vector.load %arg2[%c0_1, %c0_2] : memref<1x32xf32, #tpu.memory_space<vmem>>, vector<1x32xf32>
    %c0_3 = arith.constant 0 : index
    %c0_4 = arith.constant 0 : index
    %3 = vector.load %arg3[%c0_3, %c0_4] : memref<1x32xf32, #tpu.memory_space<vmem>>, vector<1x32xf32>
    %cst = arith.constant dense<0.000000e+00> : vector<6xf32>
    %4 = vector.multi_reduction <add>, %1, %cst [1] : vector<6x32xf32> to vector<6xf32>
    %5 = vector.shape_cast %4 : vector<6xf32> to vector<6x1xf32>
    %cst_5 = arith.constant 3.200000e+01 : f32
    %6 = vector.broadcast %cst_5 : f32 to vector<6x1xf32>
    %7 = arith.divf %5, %6 : vector<6x1xf32>
    %8 = vector.broadcast %7 : vector<6x1xf32> to vector<6x32xf32>
    %9 = arith.subf %1, %8 : vector<6x32xf32>
    %10 = arith.mulf %9, %9 : vector<6x32xf32>
    %cst_6 = arith.constant dense<0.000000e+00> : vector<6xf32>
    %11 = vector.multi_reduction <add>, %10, %cst_6 [1] : vector<6x32xf32> to vector<6xf32>
    %12 = vector.shape_cast %11 : vector<6xf32> to vector<6x1xf32>
    %cst_7 = arith.constant 3.200000e+01 : f32
    %13 = vector.broadcast %cst_7 : f32 to vector<6x1xf32>
    %14 = arith.divf %12, %13 : vector<6x1xf32>
    %cst_8 = arith.constant 9.99999974E-6 : f32
    %15 = vector.broadcast %cst_8 : f32 to vector<6x1xf32>
    %16 = arith.addf %14, %15 : vector<6x1xf32>
    %17 = math.rsqrt %16 : vector<6x1xf32>
    %18 = vector.broadcast %17 : vector<6x1xf32> to vector<6x32xf32>
    %19 = arith.mulf %9, %18 : vector<6x32xf32>
    %20 = vector.broadcast %2 : vector<1x32xf32> to vector<6x32xf32>
    %21 = arith.mulf %19, %20 : vector<6x32xf32>
    %22 = vector.broadcast %3 : vector<1x32xf32> to vector<6x32xf32>
    %23 = arith.addf %21, %22 : vector<6x32xf32>
    %24 = arith.truncf %23 : vector<6x32xf32> to vector<6x32xbf16>
    %c0_9 = arith.constant 0 : index
    %c0_10 = arith.constant 0 : index
    %25 = vector.load %arg4[%c0_9, %c0_10] : memref<32x64xbf16, #tpu.memory_space<vmem>>, vector<32x64xbf16>
    %cst_11 = arith.constant dense<0.000000e+00> : vector<6x64xf32>
    %26 = tpu.matmul %24, %25, %cst_11 {dimension_numbers = #tpu.dot_dimension_numbers<[1], [0], [0], [1], [0, 0, 1, 1], [], []>} : vector<6x32xbf16>, vector<32x64xbf16>, vector<6x64xf32> -> vector<6x64xf32>
    %c0_12 = arith.constant 0 : index
    %c0_13 = arith.constant 0 : index
    %27 = vector.load %arg5[%c0_12, %c0_13] : memref<1x64xf32, #tpu.memory_space<vmem>>, vector<1x64xf32>
    %28 = vector.broadcast %27 : vector<1x64xf32> to vector<6x64xf32>
    %29 = arith.addf %26, %28 : vector<6x64xf32>
    %cst_14 = arith.constant 5.000000e-01 : f32
    %30 = vector.broadcast %cst_14 : f32 to vector<6x64xf32>
    %31 = arith.mulf %30, %29 : vector<6x64xf32>
    %cst_15 = arith.constant 0.707106769 : f32
    %32 = vector.broadcast %cst_15 : f32 to vector<6x64xf32>
    %33 = arith.mulf %29, %32 : vector<6x64xf32>
    %34 = math.erf %33 : vector<6x64xf32>
    %cst_16 = arith.constant 1.000000e+00 : f32
    %35 = vector.broadcast %cst_16 : f32 to vector<6x64xf32>
    %36 = arith.addf %35, %34 : vector<6x64xf32>
    %37 = arith.mulf %31, %36 : vector<6x64xf32>
    %38 = arith.truncf %37 : vector<6x64xf32> to vector<6x64xbf16>
    %c0_17 = arith.constant 0 : index
    %c0_18 = arith.constant 0 : index
    %39 = vector.load %arg6[%c0_17, %c0_18] : memref<64x128xbf16, #tpu.memory_space<vmem>>, vector<64x128xbf16>
    %cst_19 = arith.constant dense<0.000000e+00> : vector<6x128xf32>
    %40 = tpu.matmul %38, %39, %cst_19 {dimension_numbers = #tpu.dot_dimension_numbers<[1], [0], [0], [1], [0, 0, 1, 1], [], []>} : vector<6x64xbf16>, vector<64x128xbf16>, vector<6x128xf32> -> vector<6x128xf32>
    %c0_20 = arith.constant 0 : index
    %c0_21 = arith.constant 0 : index
    %41 = vector.load %arg7[%c0_20, %c0_21] : memref<1x128xf32, #tpu.memory_space<vmem>>, vector<1x128xf32>
    %42 = vector.broadcast %41 : vector<1x128xf32> to vector<6x128xf32>
    %43 = arith.addf %40, %42 : vector<6x128xf32>
    %c0_22 = arith.constant 0 : index
    %c0_23 = arith.constant 0 : index
    %44 = vector.load %arg8[%c0_22, %c0_23] : memref<6x128xf32, #tpu.memory_space<vmem>>, vector<6x128xf32>
    tpu.vector_store %arg8[%c0_22, %c0_23], %43 {strides = array<i32>} : memref<6x128xf32, #tpu.memory_space<vmem>>, vector<6x128xf32>,
    return
  }
  func.func @transform_0(%arg0: i32) -> (i32, i32) {
    %c0_i32 = arith.constant 0 : i32
    %c0_i32_0 = arith.constant 0 : i32
    return %arg0, %c0_i32 : i32, i32
  }
  func.func @transform_1(%arg0: i32) -> (i32, i32) {
    %c0_i32 = arith.constant 0 : i32
    %c0_i32_0 = arith.constant 0 : i32
    %c0_i32_1 = arith.constant 0 : i32
    return %c0_i32, %c0_i32_0 : i32, i32
  }
  func.func @transform_2(%arg0: i32) -> (i32, i32) {
    %c0_i32 = arith.constant 0 : i32
    %c0_i32_0 = arith.constant 0 : i32
    %c0_i32_1 = arith.constant 0 : i32
    return %c0_i32, %c0_i32_0 : i32, i32
  }
  func.func @transform_3(%arg0: i32) -> (i32, i32) {
    %c0_i32 = arith.constant 0 : i32
    %c0_i32_0 = arith.constant 0 : i32
    %c0_i32_1 = arith.constant 0 : i32
    return %c0_i32, %c0_i32_0 : i32, i32
  }
  func.func @transform_4(%arg0: i32) -> (i32, i32) {
    %c0_i32 = arith.constant 0 : i32
    %c0_i32_0 = arith.constant 0 : i32
    %c0_i32_1 = arith.constant 0 : i32
    return %c0_i32, %c0_i32_0 : i32, i32
  }
  func.func @transform_5(%arg0: i32) -> (i32, i32) {
    %c0_i32 = arith.constant 0 : i32
    %c0_i32_0 = arith.constant 0 : i32
    %c0_i32_1 = arith.constant 0 : i32
    return %c0_i32, %c0_i32_0 : i32, i32
  }
  func.func @transform_6(%arg0: i32) -> (i32, i32) {
    %c0_i32 = arith.constant 0 : i32
    %c0_i32_0 = arith.constant 0 : i32
    %c0_i32_1 = arith.constant 0 : i32
    return %c0_i32, %c0_i32_0 : i32, i32
  }
  func.func @transform_7(%arg0: i32) -> (i32, i32) {
    %c0_i32 = arith.constant 0 : i32
    %c0_i32_0 = arith.constant 0 : i32
    return %arg0, %c0_i32 : i32, i32
  }
}

module attributes {stable_mosaic.version = 11 : i64} {
  func.func @_attn_mlp_kernel(%arg0: i32, %arg1: i32, %arg2: memref<1x4x16x8xbf16, #tpu.memory_space<vmem>>, %arg3: memref<1x4x128x8xbf16, #tpu.memory_space<vmem>>, %arg4: memref<1x4x128x8xbf16, #tpu.memory_space<vmem>>, %arg5: memref<1x16x32xbf16, #tpu.memory_space<vmem>>, %arg6: memref<4x8x32xbf16, #tpu.memory_space<vmem>>, %arg7: memref<1x32xf32, #tpu.memory_space<vmem>>, %arg8: memref<1x32xf32, #tpu.memory_space<vmem>>, %arg9: memref<1x32xf32, #tpu.memory_space<vmem>>, %arg10: memref<32x64xbf16, #tpu.memory_space<vmem>>, %arg11: memref<1x64xf32, #tpu.memory_space<vmem>>, %arg12: memref<64x32xbf16, #tpu.memory_space<vmem>>, %arg13: memref<1x32xf32, #tpu.memory_space<vmem>>, %arg14: memref<1x16x32xbf16, #tpu.memory_space<vmem>>) attributes {dimension_semantics = [#tpu.dimension_semantics<parallel>, #tpu.dimension_semantics<parallel>], iteration_bounds = array<i64: 2, 1>, scalar_prefetch = 0 : i64, scratch_operands = 0 : i64, tpu.core_type = #tpu.core_type<tc>, window_params = [{transform_indices = @transform_0, window_bounds = array<i64: 1, 4, 16, 8>}, {transform_indices = @transform_1, window_bounds = array<i64: 1, 4, 128, 8>}, {transform_indices = @transform_2, window_bounds = array<i64: 1, 4, 128, 8>}, {transform_indices = @transform_3, window_bounds = array<i64: 1, 16, 32>}, {pipeline_mode = #tpu.pipeline_mode<synchronous>, transform_indices = @transform_4, window_bounds = array<i64: 4, 8, 32>}, {pipeline_mode = #tpu.pipeline_mode<synchronous>, transform_indices = @transform_5, window_bounds = array<i64: 1, 32>}, {pipeline_mode = #tpu.pipeline_mode<synchronous>, transform_indices = @transform_6, window_bounds = array<i64: 1, 32>}, {pipeline_mode = #tpu.pipeline_mode<synchronous>, transform_indices = @transform_7, window_bounds = array<i64: 1, 32>}, {pipeline_mode = #tpu.pipeline_mode<synchronous>, transform_indices = @transform_8, window_bounds = array<i64: 32, 64>}, {pipeline_mode = #tpu.pipeline_mode<synchronous>, transform_indices = @transform_9, window_bounds = array<i64: 1, 64>}, {pipeline_mode = #tpu.pipeline_mode<synchronous>, transform_indices = @transform_10, window_bounds = array<i64: 64, 32>}, {pipeline_mode = #tpu.pipeline_mode<synchronous>, transform_indices = @transform_11, window_bounds = array<i64: 1, 32>}, {transform_indices = @transform_12, window_bounds = array<i64: 1, 16, 32>}]} {
    %c0 = arith.constant 0 : index
    %c0_0 = arith.constant 0 : index
    %c0_1 = arith.constant 0 : index
    %c0_2 = arith.constant 0 : index
    %0 = vector.load %arg2[%c0, %c0_0, %c0_1, %c0_2] : memref<1x4x16x8xbf16, #tpu.memory_space<vmem>>, vector<1x4x16x8xbf16>
    %1 = vector.shape_cast %0 : vector<1x4x16x8xbf16> to vector<4x16x8xbf16>
    %c0_3 = arith.constant 0 : index
    %c0_4 = arith.constant 0 : index
    %c0_5 = arith.constant 0 : index
    %c0_6 = arith.constant 0 : index
    %2 = vector.load %arg3[%c0_3, %c0_4, %c0_5, %c0_6] : memref<1x4x128x8xbf16, #tpu.memory_space<vmem>>, vector<1x4x128x8xbf16>
    %3 = vector.shape_cast %2 : vector<1x4x128x8xbf16> to vector<4x128x8xbf16>
    %c0_7 = arith.constant 0 : index
    %c0_8 = arith.constant 0 : index
    %c0_9 = arith.constant 0 : index
    %c0_10 = arith.constant 0 : index
    %4 = vector.load %arg4[%c0_7, %c0_8, %c0_9, %c0_10] : memref<1x4x128x8xbf16, #tpu.memory_space<vmem>>, vector<1x4x128x8xbf16>
    %5 = vector.shape_cast %4 : vector<1x4x128x8xbf16> to vector<4x128x8xbf16>
    "tpu.trace_start"() <{level = 10 : i32, message = "hqd,hkd->hqk"}> : () -> ()
    %cst = arith.constant dense<0.000000e+00> : vector<4x16x128xf32>
    %6 = tpu.matmul %1, %3, %cst {dimension_numbers = #tpu.dot_dimension_numbers<[2], [2], [1], [1], [0, 0, 0, 1, 1, 1], [0], [0]>} : vector<4x16x8xbf16>, vector<4x128x8xbf16>, vector<4x16x128xf32> -> vector<4x16x128xf32>
    "tpu.trace_stop"() : () -> ()
    %7 = tpu.iota {dimensions = array<i32: 2>} : vector<1x1x128xi32>
    %c5_i32 = arith.constant 5 : i32
    %8 = vector.broadcast %c5_i32 : i32 to vector<1x1x128xi32>
    %9 = arith.cmpi slt, %7, %8 : vector<1x1x128xi32>
    %cst_11 = arith.constant -1.000000e+30 : f32
    %10 = vector.shape_cast %9 : vector<1x1x128xi1> to vector<1x1x128xi1>
    %11 = vector.broadcast %10 : vector<1x1x128xi1> to vector<4x16x128xi1>
    %12 = vector.broadcast %cst_11 : f32 to vector<4x16x128xf32>
    %13 = arith.select %11, %6, %12 : vector<4x16x128xi1>, vector<4x16x128xf32>
    %cst_12 = arith.constant dense<0xFF800000> : vector<4x16xf32>
    %14 = vector.multi_reduction <maximumf>, %13, %cst_12 [2] : vector<4x16x128xf32> to vector<4x16xf32>
    %15 = vector.shape_cast %14 : vector<4x16xf32> to vector<4x16x1xf32>
    %16 = vector.broadcast %15 : vector<4x16x1xf32> to vector<4x16x128xf32>
    %17 = arith.subf %13, %16 : vector<4x16x128xf32>
    %18 = math.exp %17 : vector<4x16x128xf32>
    %cst_13 = arith.constant dense<0.000000e+00> : vector<4x16xf32>
    %19 = vector.multi_reduction <add>, %18, %cst_13 [2] : vector<4x16x128xf32> to vector<4x16xf32>
    %20 = vector.shape_cast %19 : vector<4x16xf32> to vector<4x16x1xf32>
    %21 = arith.truncf %18 : vector<4x16x128xf32> to vector<4x16x128xbf16>
    "tpu.trace_start"() <{level = 10 : i32, message = "hqk,hkd->hqd"}> : () -> ()
    %cst_14 = arith.constant dense<0.000000e+00> : vector<4x16x8xf32>
    %22 = tpu.matmul %21, %5, %cst_14 {dimension_numbers = #tpu.dot_dimension_numbers<[2], [1], [1], [2], [0, 0, 0, 1, 1, 2], [0], [0]>} : vector<4x16x128xbf16>, vector<4x128x8xbf16>, vector<4x16x8xf32> -> vector<4x16x8xf32>
    "tpu.trace_stop"() : () -> ()
    %23 = tpu.reciprocal %20 {approx = true} : vector<4x16x1xf32> -> vector<4x16x1xf32>
    %24 = vector.broadcast %23 : vector<4x16x1xf32> to vector<4x16x8xf32>
    %25 = arith.mulf %22, %24 : vector<4x16x8xf32>
    %26 = vector.extract_strided_slice %25 {offsets = [0, 0, 0], sizes = [1, 16, 8], strides = [1, 1, 1]} : vector<4x16x8xf32> to vector<1x16x8xf32>
    %27 = vector.shape_cast %26 : vector<1x16x8xf32> to vector<16x8xf32>
    %28 = arith.truncf %27 : vector<16x8xf32> to vector<16x8xbf16>
    %c0_15 = arith.constant 0 : index
    %c0_16 = arith.constant 0 : index
    %c0_17 = arith.constant 0 : index
    %29 = vector.load %arg6[%c0_15, %c0_16, %c0_17] : memref<4x8x32xbf16, #tpu.memory_space<vmem>>, vector<1x8x32xbf16>
    %30 = vector.shape_cast %29 : vector<1x8x32xbf16> to vector<8x32xbf16>
    %cst_18 = arith.constant dense<0.000000e+00> : vector<16x32xf32>
    %31 = tpu.matmul %28, %30, %cst_18 {dimension_numbers = #tpu.dot_dimension_numbers<[1], [0], [0], [1], [0, 0, 1, 1], [], []>} : vector<16x8xbf16>, vector<8x32xbf16>, vector<16x32xf32> -> vector<16x32xf32>
    %32 = vector.extract_strided_slice %25 {offsets = [1, 0, 0], sizes = [1, 16, 8], strides = [1, 1, 1]} : vector<4x16x8xf32> to vector<1x16x8xf32>
    %33 = vector.shape_cast %32 : vector<1x16x8xf32> to vector<16x8xf32>
    %34 = arith.truncf %33 : vector<16x8xf32> to vector<16x8xbf16>
    %c1 = arith.constant 1 : index
    %c0_19 = arith.constant 0 : index
    %c0_20 = arith.constant 0 : index
    %35 = vector.load %arg6[%c1, %c0_19, %c0_20] : memref<4x8x32xbf16, #tpu.memory_space<vmem>>, vector<1x8x32xbf16>
    %36 = vector.shape_cast %35 : vector<1x8x32xbf16> to vector<8x32xbf16>
    %cst_21 = arith.constant dense<0.000000e+00> : vector<16x32xf32>
    %37 = tpu.matmul %34, %36, %cst_21 {dimension_numbers = #tpu.dot_dimension_numbers<[1], [0], [0], [1], [0, 0, 1, 1], [], []>} : vector<16x8xbf16>, vector<8x32xbf16>, vector<16x32xf32> -> vector<16x32xf32>
    %38 = arith.addf %31, %37 : vector<16x32xf32>
    %39 = vector.extract_strided_slice %25 {offsets = [2, 0, 0], sizes = [1, 16, 8], strides = [1, 1, 1]} : vector<4x16x8xf32> to vector<1x16x8xf32>
    %40 = vector.shape_cast %39 : vector<1x16x8xf32> to vector<16x8xf32>
    %41 = arith.truncf %40 : vector<16x8xf32> to vector<16x8xbf16>
    %c2 = arith.constant 2 : index
    %c0_22 = arith.constant 0 : index
    %c0_23 = arith.constant 0 : index
    %42 = vector.load %arg6[%c2, %c0_22, %c0_23] : memref<4x8x32xbf16, #tpu.memory_space<vmem>>, vector<1x8x32xbf16>
    %43 = vector.shape_cast %42 : vector<1x8x32xbf16> to vector<8x32xbf16>
    %cst_24 = arith.constant dense<0.000000e+00> : vector<16x32xf32>
    %44 = tpu.matmul %41, %43, %cst_24 {dimension_numbers = #tpu.dot_dimension_numbers<[1], [0], [0], [1], [0, 0, 1, 1], [], []>} : vector<16x8xbf16>, vector<8x32xbf16>, vector<16x32xf32> -> vector<16x32xf32>
    %45 = arith.addf %38, %44 : vector<16x32xf32>
    %46 = vector.extract_strided_slice %25 {offsets = [3, 0, 0], sizes = [1, 16, 8], strides = [1, 1, 1]} : vector<4x16x8xf32> to vector<1x16x8xf32>
    %47 = vector.shape_cast %46 : vector<1x16x8xf32> to vector<16x8xf32>
    %48 = arith.truncf %47 : vector<16x8xf32> to vector<16x8xbf16>
    %c3 = arith.constant 3 : index
    %c0_25 = arith.constant 0 : index
    %c0_26 = arith.constant 0 : index
    %49 = vector.load %arg6[%c3, %c0_25, %c0_26] : memref<4x8x32xbf16, #tpu.memory_space<vmem>>, vector<1x8x32xbf16>
    %50 = vector.shape_cast %49 : vector<1x8x32xbf16> to vector<8x32xbf16>
    %cst_27 = arith.constant dense<0.000000e+00> : vector<16x32xf32>
    %51 = tpu.matmul %48, %50, %cst_27 {dimension_numbers = #tpu.dot_dimension_numbers<[1], [0], [0], [1], [0, 0, 1, 1], [], []>} : vector<16x8xbf16>, vector<8x32xbf16>, vector<16x32xf32> -> vector<16x32xf32>
    %52 = arith.addf %45, %51 : vector<16x32xf32>
    %c0_28 = arith.constant 0 : index
    %c0_29 = arith.constant 0 : index
    %c0_30 = arith.constant 0 : index
    %53 = vector.load %arg5[%c0_28, %c0_29, %c0_30] : memref<1x16x32xbf16, #tpu.memory_space<vmem>>, vector<1x16x32xbf16>
    %54 = vector.shape_cast %53 : vector<1x16x32xbf16> to vector<16x32xbf16>
    %55 = arith.extf %54 : vector<16x32xbf16> to vector<16x32xf32>
    %56 = arith.addf %55, %52 : vector<16x32xf32>
    %c0_31 = arith.constant 0 : index
    %c0_32 = arith.constant 0 : index
    %57 = vector.load %arg7[%c0_31, %c0_32] : memref<1x32xf32, #tpu.memory_space<vmem>>, vector<1x32xf32>
    %58 = vector.broadcast %57 : vector<1x32xf32> to vector<16x32xf32>
    %59 = arith.addf %56, %58 : vector<16x32xf32>
    %c0_33 = arith.constant 0 : index
    %c0_34 = arith.constant 0 : index
    %60 = vector.load %arg8[%c0_33, %c0_34] : memref<1x32xf32, #tpu.memory_space<vmem>>, vector<1x32xf32>
    %c0_35 = arith.constant 0 : index
    %c0_36 = arith.constant 0 : index
    %61 = vector.load %arg9[%c0_35, %c0_36] : memref<1x32xf32, #tpu.memory_space<vmem>>, vector<1x32xf32>
    %cst_37 = arith.constant dense<0.000000e+00> : vector<16xf32>
    %62 = vector.multi_reduction <add>, %59, %cst_37 [1] : vector<16x32xf32> to vector<16xf32>
    %63 = vector.shape_cast %62 : vector<16xf32> to vector<16x1xf32>
    %cst_38 = arith.constant 3.200000e+01 : f32
    %64 = vector.broadcast %cst_38 : f32 to vector<16x1xf32>
    %65 = arith.divf %63, %64 : vector<16x1xf32>
    %66 = vector.broadcast %65 : vector<16x1xf32> to vector<16x32xf32>
    %67 = arith.subf %59, %66 : vector<16x32xf32>
    %68 = arith.mulf %67, %67 : vector<16x32xf32>
    %cst_39 = arith.constant dense<0.000000e+00> : vector<16xf32>
    %69 = vector.multi_reduction <add>, %68, %cst_39 [1] : vector<16x32xf32> to vector<16xf32>
    %70 = vector.shape_cast %69 : vector<16xf32> to vector<16x1xf32>
    %cst_40 = arith.constant 3.200000e+01 : f32
    %71 = vector.broadcast %cst_40 : f32 to vector<16x1xf32>
    %72 = arith.divf %70, %71 : vector<16x1xf32>
    %cst_41 = arith.constant 9.99999974E-6 : f32
    %73 = vector.broadcast %cst_41 : f32 to vector<16x1xf32>
    %74 = arith.addf %72, %73 : vector<16x1xf32>
    %75 = math.rsqrt %74 : vector<16x1xf32>
    %76 = vector.broadcast %75 : vector<16x1xf32> to vector<16x32xf32>
    %77 = arith.mulf %67, %76 : vector<16x32xf32>
    %78 = vector.broadcast %60 : vector<1x32xf32> to vector<16x32xf32>
    %79 = arith.mulf %77, %78 : vector<16x32xf32>
    %80 = vector.broadcast %61 : vector<1x32xf32> to vector<16x32xf32>
    %81 = arith.addf %79, %80 : vector<16x32xf32>
    %82 = arith.truncf %81 : vector<16x32xf32> to vector<16x32xbf16>
    %c0_42 = arith.constant 0 : index
    %c0_43 = arith.constant 0 : index
    %83 = vector.load %arg10[%c0_42, %c0_43] : memref<32x64xbf16, #tpu.memory_space<vmem>>, vector<32x64xbf16>
    %cst_44 = arith.constant dense<0.000000e+00> : vector<16x64xf32>
    %84 = tpu.matmul %82, %83, %cst_44 {dimension_numbers = #tpu.dot_dimension_numbers<[1], [0], [0], [1], [0, 0, 1, 1], [], []>} : vector<16x32xbf16>, vector<32x64xbf16>, vector<16x64xf32> -> vector<16x64xf32>
    %c0_45 = arith.constant 0 : index
    %c0_46 = arith.constant 0 : index
    %85 = vector.load %arg11[%c0_45, %c0_46] : memref<1x64xf32, #tpu.memory_space<vmem>>, vector<1x64xf32>
    %86 = vector.broadcast %85 : vector<1x64xf32> to vector<16x64xf32>
    %87 = arith.addf %84, %86 : vector<16x64xf32>
    %cst_47 = arith.constant 5.000000e-01 : f32
    %88 = vector.broadcast %cst_47 : f32 to vector<16x64xf32>
    %89 = arith.mulf %88, %87 : vector<16x64xf32>
    %cst_48 = arith.constant 0.707106769 : f32
    %90 = vector.broadcast %cst_48 : f32 to vector<16x64xf32>
    %91 = arith.mulf %87, %90 : vector<16x64xf32>
    %92 = math.erf %91 : vector<16x64xf32>
    %cst_49 = arith.constant 1.000000e+00 : f32
    %93 = vector.broadcast %cst_49 : f32 to vector<16x64xf32>
    %94 = arith.addf %93, %92 : vector<16x64xf32>
    %95 = arith.mulf %89, %94 : vector<16x64xf32>
    %96 = arith.truncf %95 : vector<16x64xf32> to vector<16x64xbf16>
    %c0_50 = arith.constant 0 : index
    %c0_51 = arith.constant 0 : index
    %97 = vector.load %arg12[%c0_50, %c0_51] : memref<64x32xbf16, #tpu.memory_space<vmem>>, vector<64x32xbf16>
    %cst_52 = arith.constant dense<0.000000e+00> : vector<16x32xf32>
    %98 = tpu.matmul %96, %97, %cst_52 {dimension_numbers = #tpu.dot_dimension_numbers<[1], [0], [0], [1], [0, 0, 1, 1], [], []>} : vector<16x64xbf16>, vector<64x32xbf16>, vector<16x32xf32> -> vector<16x32xf32>
    %99 = arith.addf %59, %98 : vector<16x32xf32>
    %c0_53 = arith.constant 0 : index
    %c0_54 = arith.constant 0 : index
    %100 = vector.load %arg13[%c0_53, %c0_54] : memref<1x32xf32, #tpu.memory_space<vmem>>, vector<1x32xf32>
    %101 = vector.broadcast %100 : vector<1x32xf32> to vector<16x32xf32>
    %102 = arith.addf %99, %101 : vector<16x32xf32>
    %103 = arith.truncf %102 : vector<16x32xf32> to vector<16x32xbf16>
    %c0_55 = arith.constant 0 : index
    %c0_56 = arith.constant 0 : index
    %c0_57 = arith.constant 0 : index
    %104 = vector.load %arg14[%c0_55, %c0_56, %c0_57] : memref<1x16x32xbf16, #tpu.memory_space<vmem>>, vector<1x16x32xbf16>
    %105 = vector.shape_cast %104 : vector<1x16x32xbf16> to vector<16x32xbf16>
    %106 = vector.shape_cast %103 : vector<16x32xbf16> to vector<1x16x32xbf16>
    tpu.vector_store %arg14[%c0_55, %c0_56, %c0_57], %106 {strides = array<i32>} : memref<1x16x32xbf16, #tpu.memory_space<vmem>>, vector<1x16x32xbf16>,
    return
  }
  func.func @transform_0(%arg0: i32, %arg1: i32) -> (i32, i32, i32, i32) {
    %c0_i32 = arith.constant 0 : i32
    %c0_i32_0 = arith.constant 0 : i32
    %c0_i32_1 = arith.constant 0 : i32
    return %arg0, %c0_i32, %arg1, %c0_i32_0 : i32, i32, i32, i32
  }
  func.func @transform_1(%arg0: i32, %arg1: i32) -> (i32, i32, i32, i32) {
    %c0_i32 = arith.constant 0 : i32
    %c0_i32_0 = arith.constant 0 : i32
    %c0_i32_1 = arith.constant 0 : i32
    %c0_i32_2 = arith.constant 0 : i32
    return %arg0, %c0_i32, %c0_i32_0, %c0_i32_1 : i32, i32, i32, i32
  }
  func.func @transform_2(%arg0: i32, %arg1: i32) -> (i32, i32, i32, i32) {
    %c0_i32 = arith.constant 0 : i32
    %c0_i32_0 = arith.constant 0 : i32
    %c0_i32_1 = arith.constant 0 : i32
    %c0_i32_2 = arith.constant 0 : i32
    return %arg0, %c0_i32, %c0_i32_0, %c0_i32_1 : i32, i32, i32, i32
  }
  func.func @transform_3(%arg0: i32, %arg1: i32) -> (i32, i32, i32) {
    %c0_i32 = arith.constant 0 : i32
    %c0_i32_0 = arith.constant 0 : i32
    return %arg0, %arg1, %c0_i32 : i32, i32, i32
  }
  func.func @transform_4(%arg0: i32, %arg1: i32) -> (i32, i32, i32) {
    %c0_i32 = arith.constant 0 : i32
    %c0_i32_0 = arith.constant 0 : i32
    %c0_i32_1 = arith.constant 0 : i32
    %c0_i32_2 = arith.constant 0 : i32
    return %c0_i32, %c0_i32_0, %c0_i32_1 : i32, i32, i32
  }
  func.func @transform_5(%arg0: i32, %arg1: i32) -> (i32, i32) {
    %c0_i32 = arith.constant 0 : i32
    %c0_i32_0 = arith.constant 0 : i32
    %c0_i32_1 = arith.constant 0 : i32
    return %c0_i32, %c0_i32_0 : i32, i32
  }
  func.func @transform_6(%arg0: i32, %arg1: i32) -> (i32, i32) {
    %c0_i32 = arith.constant 0 : i32
    %c0_i32_0 = arith.constant 0 : i32
    %c0_i32_1 = arith.constant 0 : i32
    return %c0_i32, %c0_i32_0 : i32, i32
  }
  func.func @transform_7(%arg0: i32, %arg1: i32) -> (i32, i32) {
    %c0_i32 = arith.constant 0 : i32
    %c0_i32_0 = arith.constant 0 : i32
    %c0_i32_1 = arith.constant 0 : i32
    return %c0_i32, %c0_i32_0 : i32, i32
  }
  func.func @transform_8(%arg0: i32, %arg1: i32) -> (i32, i32) {
    %c0_i32 = arith.constant 0 : i32
    %c0_i32_0 = arith.constant 0 : i32
    %c0_i32_1 = arith.constant 0 : i32
    return %c0_i32, %c0_i32_0 : i32, i32
  }
  func.func @transform_9(%arg0: i32, %arg1: i32) -> (i32, i32) {
    %c0_i32 = arith.constant 0 : i32
    %c0_i32_0 = arith.constant 0 : i32
    %c0_i32_1 = arith.constant 0 : i32
    return %c0_i32, %c0_i32_0 : i32, i32
  }
  func.func @transform_10(%arg0: i32, %arg1: i32) -> (i32, i32) {
    %c0_i32 = arith.constant 0 : i32
    %c0_i32_0 = arith.constant 0 : i32
    %c0_i32_1 = arith.constant 0 : i32
    return %c0_i32, %c0_i32_0 : i32, i32
  }
  func.func @transform_11(%arg0: i32, %arg1: i32) -> (i32, i32) {
    %c0_i32 = arith.constant 0 : i32
    %c0_i32_0 = arith.constant 0 : i32
    %c0_i32_1 = arith.constant 0 : i32
    return %c0_i32, %c0_i32_0 : i32, i32
  }
  func.func @transform_12(%arg0: i32, %arg1: i32) -> (i32, i32, i32) {
    %c0_i32 = arith.constant 0 : i32
    %c0_i32_0 = arith.constant 0 : i32
    return %arg0, %arg1, %c0_i32 : i32, i32, i32
  }
}

</mosaic_0001>

<bundles_post_ra>
// kernel: icl_forward.8
= control target key start
LH: loop header
LB: loop body
LE: loop exit
PB: predicated region body
PF: predicated region fallthrough
CT: control target
= control target key end

     0   :  { %vm27_vm0 = vcmask 261120   ;;  %vm31_vm1 = vcmask 254976   ;;  %v159_v6 = vmov 32.0   ;;  %vm130_vm9 = vcmask 519168   ;;  %s222_s0 = inlined_call_operand.vmem [shape: bf16[10,32], index: 0, kind: input, shape index: {}]   ;;  %s223_s1 = inlined_call_operand.vmem [shape: f32[1,32], index: 1, kind: input, shape index: {}]   ;;  %s224_s2 = inlined_call_operand.vmem [shape: f32[1,32], index: 2, kind: input, shape index: {}]   ;;  %s225_s4 = inlined_call_operand.vmem [shape: f32[1,64], index: 4, kind: input, shape index: {}]   ;;  %s226_s3 = inlined_call_operand.vmem [shape: bf16[32,64], index: 3, kind: input, shape index: {}]   ;;  %s227_s5 = inlined_call_operand.vmem [shape: bf16[10,64], index: 5, kind: output, shape index: {}]  }
   0x1   :  { %v21_v0 = vld [vmem:[%s222_s0] sm:$0xf]  ;;  %v22_v2 = vld [vmem:[%s222_s0 + $0x4] sm:$0x1]  ;;  %153 = vrcp.f32 %v159_v6  ;;  %v148_v23 = vld [vmem:[%s226_s3 + $0x8] sm:$0xff]  ;;  %vm132_vm10 = vcmask 516096  }
   0x2   :  { %v23_v1 = vunpack.c.l.bf16 %v21_v0  ;;  %v24_v4 = vunpack.c.l.bf16 %v22_v2  ;;  %120 = vmatpush.bf16.msra.mxu0 %v148_v23  ;;  %v147_v25 = vld [vmem:[%s226_s3] sm:$0xff] }
   0x3   :  { %v150_v44 = vld [vmem:[%s223_s1] ss:$0 sm:$0xff] }
   0x4   :  { %v28_v3 = vsel %vm27_vm0, %v23_v1, 0.0  ;;  %v32_v5 = vsel %vm31_vm1, %v24_v4, 0.0  ;;  %v151_v49 = vld [vmem:[%s224_s2] ss:$0 sm:$0xff] }
   0x5   :  { %29 = vadd.xlane.f32.xlu0 %v28_v3  ;;  %v152_v54 = vld [vmem:[%s225_s4] ss:$0 sm:$0xff] }
   0x6   :  { %121 = vmatpush.bf16.msra.mxu0 %v147_v25 }
   0x7   :  { %v154_v7 = vpop.eup %153 }
   0x8   :  { %v36_v8 = vmul.f32 32.0, %v154_v7  ;;  %vm40_vm2 = vweird.f32 %v154_v7 }
   0xa   :  { %v37_v9 = vsub.f32 1.0, %v36_v8 }
   0xc   :  { %v38_v10 = vmul.f32 %v154_v7, %v37_v9 }
   0xd   :  { %33 = vadd.xlane.f32.xlu0 %v32_v5 }
   0xe   :  { %v39_v11 = vadd.f32 %v154_v7, %v38_v10 }
  0x10   :  { %v41_v12 = vsel %vm40_vm2, %v154_v7, %v39_v11 }
  0x78   :  { %v30_v13 = vpop.xlane.xlu0 %29 }
  0x79   :  { %v42_v14 = vmul.f32 %v41_v12, %v30_v13 }
  0x7b   :  { %v44_v15 = vsub.f32 %v23_v1, %v42_v14 }
  0x7d   :  { %v46_v16 = vmul.f32 %v44_v15, %v44_v15 }
  0x7f   :  { %v48_v17 = vsel %vm27_vm0, %v46_v16, 0.0 }
  0x80   :  { %49 = vadd.xlane.f32.xlu1 %v48_v17  ;;  %v34_v18 = vpop.xlane.xlu0 %33 }
  0x81   :  { %v43_v19 = vmul.f32 %v41_v12, %v34_v18 }
  0x83   :  { %v45_v20 = vsub.f32 %v24_v4, %v43_v19 }
  0x85   :  { %v47_v21 = vmul.f32 %v45_v20, %v45_v20 }
  0x87   :  { %v51_v22 = vsel %vm31_vm1, %v47_v21, 0.0 }
  0x88   :  { %52 = vadd.xlane.f32.xlu1 %v51_v22 }
  0xf3   :  { %v50_v24 = vpop.xlane.xlu1 %49 }
  0xf4   :  { %v54_v26 = vmul.f32 %v50_v24, %v41_v12 }
  0xf6   :  { %v56_v27 = vadd.f32 1e-05, %v54_v26 }
  0xf8   :  { %155 = vrsqrt.f32 %v56_v27  ;;  %vm64_vm4 = vweird.f32 %v56_v27 }
  0xfb   :  { %v53_v28 = vpop.xlane.xlu1 %52 }
  0xfc   :  { %v55_v29 = vmul.f32 %v53_v28, %v41_v12 }
  0xfe   :  { %v156_v30 = vpop.eup %155  ;;  %v57_v31 = vadd.f32 1e-05, %v55_v29 }
  0xff   :  { %v59_v32 = vmul.f32 %v156_v30, %v56_v27  ;;  %vm65_vm3 = vweird.f32 %v156_v30 }
 0x100   :  { %157 = vrsqrt.f32 %v57_v31  ;;  %vm66_vm5 = vmor %vm64_vm4, %vm65_vm3  ;;  %vm74_vm7 = vweird.f32 %v57_v31 }
 0x101   :  { %v60_v33 = vmul.f32 %v156_v30, %v59_v32 }
 0x103   :  { %v61_v34 = vmul.f32 0.5, %v60_v33 }
 0x105   :  { %v62_v35 = vsub.f32 1.5, %v61_v34 }
 0x106   :  { %v158_v36 = vpop.eup %157 }
 0x107   :  { %v63_v37 = vmul.f32 %v156_v30, %v62_v35  ;;  %v69_v38 = vmul.f32 %v158_v36, %v57_v31  ;;  %vm75_vm6 = vweird.f32 %v158_v36 }
 0x108   :  { %vm76_vm8 = vmor %vm74_vm7, %vm75_vm6 }
 0x109   :  { %v70_v39 = vmul.f32 %v158_v36, %v69_v38  ;;  %v67_v40 = vsel %vm66_vm5, %v156_v30, %v63_v37 }
 0x10a   :  { %v78_v43 = vmul.f32 %v67_v40, %v44_v15 }
 0x10b   :  { %v71_v41 = vmul.f32 0.5, %v70_v39 }
 0x10c   :  { %v83_v48 = vmul.f32 %v150_v44, %v78_v43 }
 0x10d   :  { %v72_v42 = vsub.f32 1.5, %v71_v41 }
 0x10e   :  { %v88_v51 = vadd.f32 %v151_v49, %v83_v48 }
 0x10f   :  { %v73_v45 = vmul.f32 %v158_v36, %v72_v42 }
 0x111   :  { %v77_v46 = vsel %vm76_vm8, %v158_v36, %v73_v45 }
 0x112   :  { %v79_v47 = vmul.f32 %v77_v46, %v45_v20 }
 0x114   :  { %v84_v50 = vmul.f32 %v150_v44, %v79_v47 }
 0x116   :  { %v89_v52 = vadd.f32 %v151_v49, %v84_v50 }
 0x118   :  { %v90_v53 = vpack.c.bf16 %v89_v52, %v88_v51 }
 0x11a   :  { %146 = vmatmul.msk.bf16.vlgmr.msra.gmra.mxu0 %vm27_vm0, %v90_v53 }
 0x197   :  { %v123_v55 = vpop.f32.mrf.mxu0 }
 0x198   :  { %v124_v56 = vadd.f32 %v152_v54, %v123_v55 }
 0x19a   :  { %v128_v57 = vpack.c.bf16 %v124_v56, %v124_v56 }
 0x19c   :  { %131 = vst.msk [vmem:[%s227_s5] sm:$0xf] %vm130_vm9, %v128_v57 }
 0x19f   :  { %v125_v58 = vpop.f32.mrf.mxu0 }
 0x1a0   :  { %v126_v59 = vadd.f32 %v152_v54, %v125_v58 }
 0x1a2   :  { %v129_v60 = vpack.c.bf16 %v126_v59, %v126_v59 }
 0x1a4   :  { %133 = vst.msk [vmem:[%s227_s5 + $0x4] sm:$0x1] %vm132_vm10, %v129_v60 }

// kernel: icl_forward.7
= control target key start
LH: loop header
LB: loop body
LE: loop exit
PB: predicated region body
PF: predicated region fallthrough
CT: control target
= control target key end

     0   :  { %vm31_vm0 = vcmask 261120   ;;  %v238_v10 = vmov 32.0   ;;  %vm192_vm14 = vcmask 257024   ;;  %s332_s0 = inlined_call_operand.vmem [shape: bf16[32,32], index: 0, kind: input, shape index: {}]   ;;  %s333_s1 = inlined_call_operand.vmem [shape: f32[1,32], index: 1, kind: input, shape index: {}]   ;;  %s334_s2 = inlined_call_operand.vmem [shape: f32[1,32], index: 2, kind: input, shape index: {}]   ;;  %s335_s4 = inlined_call_operand.vmem [shape: f32[1,32], index: 4, kind: input, shape index: {}]   ;;  %s336_s3 = inlined_call_operand.vmem [shape: bf16[32,32], index: 3, kind: input, shape index: {}]   ;;  %s337_s5 = inlined_call_operand.vmem [shape: bf16[32,32], index: 5, kind: output, shape index: {}]  }
   0x1   :  { %v221_v0 = vld [vmem:[%s332_s0 + $0x8] sm:$0xff]   ;;  %v214_v1 = vld [vmem:[%s332_s0] sm:$0xff]   ;;  %228 = vrcp.f32 %v238_v10 }
   0x2   :  { %v219_v2 = vunpack.c.l.bf16 %v221_v0  ;;  %v215_v3 = vunpack.c.l.bf16 %v214_v1  ;;  %v220_v6 = vunpack.c.h.bf16 %v221_v0  ;;  %v216_v7 = vunpack.c.h.bf16 %v214_v1  ;;  %v212_v37 = vld [vmem:[%s336_s3 + $0x8] sm:$0xff]  ;;  %v211_v42 = vld [vmem:[%s336_s3] sm:$0xff] }
   0x3   :  { %175 = vmatpush.bf16.msra.mxu0 %v212_v37  ;;  %222 = vmatpush.bf16.msra.mxu1 %v212_v37 }
   0x4   :  { %v38_v4 = vsel %vm31_vm0, %v219_v2, 0.0  ;;  %v32_v5 = vsel %vm31_vm0, %v215_v3, 0.0  ;;  %v41_v8 = vsel %vm31_vm0, %v220_v6, 0.0  ;;  %v35_v9 = vsel %vm31_vm0, %v216_v7, 0.0 }
   0x5   :  { %39 = vadd.xlane.f32.xlu1 %v38_v4  ;;  %33 = vadd.xlane.f32.xlu0 %v32_v5 }
   0x7   :  { %v229_v11 = vpop.eup %228  ;;  %176 = vmatpush.bf16.msra.mxu0 %v211_v42  ;;  %223 = vmatpush.bf16.msra.mxu1 %v211_v42 }
   0x8   :  { %v45_v12 = vmul.f32 32.0, %v229_v11  ;;  %vm49_vm1 = vweird.f32 %v229_v11 }
   0xa   :  { %v46_v13 = vsub.f32 1.0, %v45_v12  ;;  %v225_v12 = vld [vmem:[%s333_s1] ss:$0 sm:$0xff] }
   0xc   :  { %v47_v14 = vmul.f32 %v229_v11, %v46_v13 }
   0xd   :  { %42 = vadd.xlane.f32.xlu1 %v41_v8  ;;  %36 = vadd.xlane.f32.xlu0 %v35_v9 }
   0xe   :  { %v48_v15 = vadd.f32 %v229_v11, %v47_v14 }
  0x10   :  { %v50_v16 = vsel %vm49_vm1, %v229_v11, %v48_v15 }
  0x78   :  { %v40_v17 = vpop.xlane.xlu1 %39  ;;  %v34_v18 = vpop.xlane.xlu0 %33 }
  0x79   :  { %v53_v19 = vmul.f32 %v50_v16, %v40_v17  ;;  %v51_v20 = vmul.f32 %v50_v16, %v34_v18 }
  0x7b   :  { %v279_v21 = vsub.f32 %v219_v2, %v53_v19  ;;  %v281_v22 = vsub.f32 %v215_v3, %v51_v20  ;;  %v226_v19 = vld [vmem:[%s334_s2] ss:$0 sm:$0xff] }
  0x7d   :  { %v61_v23 = vmul.f32 %v279_v21, %v279_v21  ;;  %v59_v24 = vmul.f32 %v281_v22, %v281_v22 }
  0x7f   :  { %v69_v25 = vsel %vm31_vm0, %v61_v23, 0.0  ;;  %v63_v26 = vsel %vm31_vm0, %v59_v24, 0.0 }
  0x80   :  { %v43_v27 = vpop.xlane.xlu1 %42  ;;  %70 = vadd.xlane.f32.xlu0 %v69_v25  ;;  %64 = vadd.xlane.f32.xlu2 %v63_v26  ;;  %v37_v28 = vpop.xlane.xlu0 %36 }
  0x81   :  { %v54_v29 = vmul.f32 %v50_v16, %v43_v27  ;;  %v52_v30 = vmul.f32 %v50_v16, %v37_v28 }
  0x83   :  { %v289_v31 = vsub.f32 %v220_v6, %v54_v29  ;;  %v291_v32 = vsub.f32 %v216_v7, %v52_v30 }
  0x85   :  { %v62_v33 = vmul.f32 %v289_v31, %v289_v31  ;;  %v60_v34 = vmul.f32 %v291_v32, %v291_v32 }
  0x87   :  { %v72_v35 = vsel %vm31_vm0, %v62_v33, 0.0  ;;  %v66_v36 = vsel %vm31_vm0, %v60_v34, 0.0 }
  0x88   :  { %73 = vadd.xlane.f32.xlu1 %v72_v35  ;;  %67 = vadd.xlane.f32.xlu2 %v66_v36 }
  0xf3   :  { %v65_v38 = vpop.xlane.xlu2 %64  ;;  %v71_v39 = vpop.xlane.xlu0 %70 }
  0xf4   :  { %v75_v40 = vmul.f32 %v65_v38, %v50_v16  ;;  %v77_v41 = vmul.f32 %v71_v39, %v50_v16 }
  0xf6   :  { %v79_v43 = vadd.f32 1e-05, %v75_v40  ;;  %v81_v44 = vadd.f32 1e-05, %v77_v41 }
  0xf8   :  { %230 = vrsqrt.f32 %v79_v43  ;;  %vm109_vm4 = vweird.f32 %v81_v44  ;;  %vm89_vm5 = vweird.f32 %v79_v43 }
  0xf9   :  { %232 = vrsqrt.f32 %v81_v44 }
  0xfb   :  { %v74_v45 = vpop.xlane.xlu1 %73  ;;  %v68_v46 = vpop.xlane.xlu2 %67 }
  0xfc   :  { %v78_v47 = vmul.f32 %v74_v45, %v50_v16  ;;  %v76_v48 = vmul.f32 %v68_v46, %v50_v16 }
  0xfe   :  { %v231_v49 = vpop.eup %230  ;;  %v82_v50 = vadd.f32 1e-05, %v78_v47  ;;  %v80_v51 = vadd.f32 1e-05, %v76_v48 }
  0xff   :  { %v233_v52 = vpop.eup %232  ;;  %v84_v53 = vmul.f32 %v231_v49, %v79_v43  ;;  %vm90_vm3 = vweird.f32 %v231_v49 }
 0x100   :  { %v104_v54 = vmul.f32 %v233_v52, %v81_v44  ;;  %234 = vrsqrt.f32 %v82_v50  ;;  %vm110_vm2 = vweird.f32 %v233_v52  ;;  %vm91_vm7 = vmor %vm89_vm5, %vm90_vm3  ;;  %vm119_vm10 = vweird.f32 %v82_v50 }
 0x101   :  { %v85_v55 = vmul.f32 %v231_v49, %v84_v53  ;;  %236 = vrsqrt.f32 %v80_v51  ;;  %vm111_vm6 = vmor %vm109_vm4, %vm110_vm2  ;;  %vm99_vm12 = vweird.f32 %v80_v51 }
 0x102   :  { %v105_v56 = vmul.f32 %v233_v52, %v104_v54 }
 0x103   :  { %v86_v57 = vmul.f32 0.5, %v85_v55 }
 0x104   :  { %v106_v58 = vmul.f32 0.5, %v105_v56 }
 0x105   :  { %v87_v59 = vsub.f32 1.5, %v86_v57 }
 0x106   :  { %v235_v60 = vpop.eup %234  ;;  %v107_v61 = vsub.f32 1.5, %v106_v58 }
 0x107   :  { %v237_v62 = vpop.eup %236  ;;  %v114_v63 = vmul.f32 %v235_v60, %v82_v50  ;;  %v88_v0 = vmul.f32 %v231_v49, %v87_v59  ;;  %vm120_vm8 = vweird.f32 %v235_v60 }
 0x108   :  { %v108_v1 = vmul.f32 %v233_v52, %v107_v61  ;;  %v94_v2 = vmul.f32 %v237_v62, %v80_v51  ;;  %vm100_vm9 = vweird.f32 %v237_v62  ;;  %vm121_vm11 = vmor %vm119_vm10, %vm120_vm8 }
 0x109   :  { %v115_v3 = vmul.f32 %v235_v60, %v114_v63  ;;  %v92_v7 = vsel %vm91_vm7, %v231_v49, %v88_v0  ;;  %vm101_vm13 = vmor %vm99_vm12, %vm100_vm9 }
 0x10a   :  { %v95_v4 = vmul.f32 %v237_v62, %v94_v2  ;;  %v112_v5 = vsel %vm111_vm6, %v233_v52, %v108_v1  ;;  %v123_v13 = vmul.f32 %v92_v7, %v281_v22 }
 0x10b   :  { %v116_v6 = vmul.f32 0.5, %v115_v3  ;;  %v125_v10 = vmul.f32 %v112_v5, %v279_v21 }
 0x10c   :  { %v96_v8 = vmul.f32 0.5, %v95_v4  ;;  %v130_v23 = vmul.f32 %v225_v12, %v123_v13 }
 0x10d   :  { %v117_v9 = vsub.f32 1.5, %v116_v6  ;;  %v132_v20 = vmul.f32 %v225_v12, %v125_v10 }
 0x10e   :  { %v97_v11 = vsub.f32 1.5, %v96_v8  ;;  %v137_v27 = vadd.f32 %v226_v19, %v130_v23 }
 0x10f   :  { %v118_v14 = vmul.f32 %v235_v60, %v117_v9  ;;  %v139_v25 = vadd.f32 %v226_v19, %v132_v20 }
 0x110   :  { %v98_v15 = vmul.f32 %v237_v62, %v97_v11 }
 0x111   :  { %v122_v16 = vsel %vm121_vm11, %v235_v60, %v118_v14 }
 0x112   :  { %v126_v17 = vmul.f32 %v122_v16, %v289_v31  ;;  %v102_v18 = vsel %vm101_vm13, %v237_v62, %v98_v15  ;;  %v227_v31 = vld [vmem:[%s335_s4] ss:$0 sm:$0xff] }
 0x113   :  { %v124_v21 = vmul.f32 %v102_v18, %v291_v32 }
 0x114   :  { %v133_v24 = vmul.f32 %v225_v12, %v126_v17 }
 0x115   :  { %v131_v22 = vmul.f32 %v225_v12, %v124_v21 }
 0x116   :  { %v140_v26 = vadd.f32 %v226_v19, %v133_v24 }
 0x117   :  { %v138_v28 = vadd.f32 %v226_v19, %v131_v22 }
 0x118   :  { %v142_v29 = vpack.c.bf16 %v140_v26, %v139_v25 }
 0x119   :  { %v141_v30 = vpack.c.bf16 %v138_v28, %v137_v27 }
 0x11a   :  { %210 = vmatmul.msk.bf16.vlgmr.msra.gmra.mxu1 %vm31_vm0, %v142_v29 }
 0x11b   :  { %209 = vmatmul.msk.bf16.vlgmr.msra.gmra.mxu0 %vm31_vm0, %v141_v30 }
 0x197   :  { %v183_v33 = vpop.f32.mrf.mxu1 }
 0x198   :  { %v178_v34 = vpop.f32.mrf.mxu0  ;;  %v184_v32 = vadd.f32 %v227_v31, %v183_v33 }
 0x199   :  { %v179_v35 = vadd.f32 %v227_v31, %v178_v34 }
 0x19a   :  { %v190_v36 = vpack.c.bf16 %v184_v32, %v184_v32 }
 0x19b   :  { %v188_v37 = vpack.c.bf16 %v179_v35, %v179_v35 }
 0x19c   :  { %195 = vst.msk [vmem:[%s337_s5 + $0x8] sm:$0xf] %vm192_vm14, %v190_v36 }
 0x19d   :  { %193 = vst.msk [vmem:[%s337_s5] sm:$0xf] %vm192_vm14, %v188_v37 }
 0x19f   :  { %v185_v38 = vpop.f32.mrf.mxu1 }
 0x1a0   :  { %v180_v39 = vpop.f32.mrf.mxu0  ;;  %v186_v40 = vadd.f32 %v227_v31, %v185_v38 }
 0x1a1   :  { %v181_v41 = vadd.f32 %v227_v31, %v180_v39 }
 0x1a2   :  { %v191_v42 = vpack.c.bf16 %v186_v40, %v186_v40 }
 0x1a3   :  { %v189_v43 = vpack.c.bf16 %v181_v41, %v181_v41 }
 0x1a4   :  { %196 = vst.msk [vmem:[%s337_s5 + $0xc] sm:$0xf] %vm192_vm14, %v191_v42 }
 0x1a5   :  { %194 = vst.msk [vmem:[%s337_s5 + $0x4] sm:$0xf] %vm192_vm14, %v189_v43 }

// kernel: icl_forward.13
= control target key start
LH: loop header
LB: loop body
LE: loop exit
PB: predicated region body
PF: predicated region fallthrough
CT: control target
= control target key end

     0   :  { %vm31_vm0 = vcmask 259072   ;;  %v254_v3 = vmov 32.0   ;;  %vm90_vm5 = vcmask 261120   ;;  %vm188_vm10 = vcmask 523264   ;;  %s333_s0 = inlined_call_operand.vmem [shape: bf16[6,32], index: 0, kind: input, shape index: {}]   ;;  %s334_s1 = inlined_call_operand.vmem [shape: f32[1,32], index: 1, kind: input, shape index: {}]   ;;  %s335_s2 = inlined_call_operand.vmem [shape: f32[1,32], index: 2, kind: input, shape index: {}]   ;;  %s336_s4 = inlined_call_operand.vmem [shape: f32[1,64], index: 4, kind: input, shape index: {}]   ;;  %s337_s3 = inlined_call_operand.vmem [shape: bf16[32,64], index: 3, kind: input, shape index: {}]   ;;  %s338_s6 = inlined_call_operand.vmem [shape: f32[1,128], index: 6, kind: input, shape index: {}]   ;;  %s339_s5 = inlined_call_operand.vmem [shape: bf16[64,128], index: 5, kind: input, shape index: {}]   ;;  %s340_s7 = inlined_call_operand.vmem [shape: f32[6,128], index: 7, kind: output, shape index: {}]  }
   0x1   :  { %v27_v0 = vld [vmem:[%s333_s0] sm:$0x7]  ;;  %248 = vrcp.f32 %v254_v3  ;;  %v238_v15 = vld [vmem:[%s337_s3 + $0x8] sm:$0xff]  ;;  %v242_v40 = vld [vmem:[%s339_s5 + $0x18] sm:$0xff] }
   0x2   :  { %v28_v1 = vunpack.c.l.bf16 %v27_v0  ;;  %100 = vmatpush.bf16.msra.mxu0 %v238_v15  ;;  %v237_v16 = vld [vmem:[%s337_s3] sm:$0xff]  ;;  %196 = vmatpush.bf16.msra.mxu1 %v242_v40  ;;  %v241_v45 = vld [vmem:[%s339_s5 + $0x10] sm:$0xff]  ;;  %v240_v48 = vld [vmem:[%s339_s5 + $0x8] sm:$0xff] }
   0x3   :  { %v244_v26 = vld [vmem:[%s334_s1] ss:$0 sm:$0xff] }
   0x4   :  { %v32_v2 = vsel %vm31_vm0, %v28_v1, 0.0  ;;  %v245_v29 = vld [vmem:[%s335_s2] ss:$0 sm:$0xff] }
   0x5   :  { %33 = vadd.xlane.f32.xlu0 %v32_v2  ;;  %v246_v33 = vld [vmem:[%s336_s4] ss:$0 sm:$0xff] }
   0x6   :  { %101 = vmatpush.bf16.msra.mxu0 %v237_v16  ;;  %197 = vmatpush.bf16.msra.mxu1 %v241_v45  ;;  %v239_v52 = vld [vmem:[%s339_s5] sm:$0xff] }
   0x7   :  { %v249_v4 = vpop.eup %248 }
   0x8   :  { %v36_v5 = vmul.f32 32.0, %v249_v4  ;;  %vm40_vm1 = vweird.f32 %v249_v4 }
   0xa   :  { %v37_v6 = vsub.f32 1.0, %v36_v5  ;;  %198 = vmatpush.bf16.msra.mxu1 %v240_v48 }
   0xc   :  { %v38_v7 = vmul.f32 %v249_v4, %v37_v6 }
   0xe   :  { %v39_v8 = vadd.f32 %v249_v4, %v38_v7  ;;  %199 = vmatpush.bf16.msra.mxu1 %v239_v52 }
  0x10   :  { %v41_v9 = vsel %vm40_vm1, %v249_v4, %v39_v8 }
  0x78   :  { %v34_v10 = vpop.xlane.xlu0 %33 }
  0x79   :  { %v42_v11 = vmul.f32 %v41_v9, %v34_v10 }
  0x7b   :  { %v43_v12 = vsub.f32 %v28_v1, %v42_v11 }
  0x7d   :  { %v44_v13 = vmul.f32 %v43_v12, %v43_v12 }
  0x7f   :  { %v45_v14 = vsel %vm31_vm0, %v44_v13, 0.0 }
  0x80   :  { %46 = vadd.xlane.f32.xlu0 %v45_v14 }
  0xf3   :  { %v47_v17 = vpop.xlane.xlu0 %46 }
  0xf4   :  { %v48_v18 = vmul.f32 %v47_v17, %v41_v9  ;;  %v247_v17 = vld [vmem:[%s338_s6] ss:$0 sm:$0xff] }
  0xf6   :  { %v49_v19 = vadd.f32 1e-05, %v48_v18 }
  0xf8   :  { %250 = vrsqrt.f32 %v49_v19  ;;  %vm56_vm3 = vweird.f32 %v49_v19 }
  0xfe   :  { %v251_v20 = vpop.eup %250 }
  0xff   :  { %v51_v21 = vmul.f32 %v251_v20, %v49_v19  ;;  %vm57_vm2 = vweird.f32 %v251_v20 }
 0x100   :  { %vm58_vm4 = vmor %vm56_vm3, %vm57_vm2 }
 0x101   :  { %v52_v22 = vmul.f32 %v251_v20, %v51_v21 }
 0x103   :  { %v53_v23 = vmul.f32 0.5, %v52_v22 }
 0x105   :  { %v54_v24 = vsub.f32 1.5, %v53_v23 }
 0x107   :  { %v55_v25 = vmul.f32 %v251_v20, %v54_v24 }
 0x109   :  { %v59_v27 = vsel %vm58_vm4, %v251_v20, %v55_v25 }
 0x10a   :  { %v60_v28 = vmul.f32 %v59_v27, %v43_v12 }
 0x10c   :  { %v64_v30 = vmul.f32 %v244_v26, %v60_v28 }
 0x10e   :  { %v68_v31 = vadd.f32 %v245_v29, %v64_v30 }
 0x110   :  { %v69_v32 = vpack.c.bf16 %v68_v31, %v68_v31 }
 0x112   :  { %218 = vmatmul.msk.bf16.vlgmr.msra.gmra.mxu0 %vm90_vm5, %v69_v32 }
 0x18f   :  { %v103_v34 = vpop.f32.mrf.mxu0 }
 0x190   :  { %v104_v35 = vadd.f32 %v246_v33, %v103_v34 }
 0x192   :  { %v108_v36 = vmul.f32 0.70710677, %v104_v35  ;;  %v107_v13 = vmul.f32 0.5, %v104_v35 }
 0x194   :  { %v109_v37 = vmul.f32 %v108_v36, %v108_v36 }
 0x196   :  { %v110_v38 = vmin.f32 %v109_v37, 16.0 }
 0x197   :  { %v105_v39 = vpop.f32.mrf.mxu0 }
 0x198   :  { %v111_v41 = vmul.f32 2.1237322e-06, %v110_v38  ;;  %v122_v42 = vmul.f32 3.8918573e-05, %v110_v38 }
 0x19a   :  { %v112_v43 = vadd.f32 0.00028619796, %v111_v41  ;;  %v123_v44 = vadd.f32 0.001143296, %v122_v42 }
 0x19c   :  { %v113_v46 = vmul.f32 %v112_v43, %v110_v38  ;;  %v124_v47 = vmul.f32 %v123_v44, %v110_v38 }
 0x19e   :  { %v125_v49 = vadd.f32 0.014752088, %v124_v47  ;;  %v114_v50 = vadd.f32 0.0036580483, %v113_v46 }
 0x1a0   :  { %v126_v51 = vmul.f32 %v125_v49, %v110_v38  ;;  %v115_v54 = vmul.f32 %v114_v50, %v110_v38 }
 0x1a2   :  { %v127_v53 = vadd.f32 0.112945676, %v126_v51  ;;  %v116_v57 = vadd.f32 0.05243302, %v115_v54 }
 0x1a4   :  { %v128_v55 = vmul.f32 %v127_v53, %v110_v38  ;;  %v117_v60 = vmul.f32 %v116_v57, %v110_v38 }
 0x1a6   :  { %v129_v56 = vadd.f32 0.4994258, %v128_v55  ;;  %v118_v61 = vadd.f32 0.18741608, %v117_v60 }
 0x1a8   :  { %v130_v58 = vmul.f32 %v129_v56, %v110_v38  ;;  %v119_v63 = vmul.f32 %v118_v61, %v110_v38 }
 0x1aa   :  { %v131_v59 = vadd.f32 1.0, %v130_v58  ;;  %v120_v3 = vadd.f32 1.1283791, %v119_v63 }
 0x1ac   :  { %252 = vrcp.f32 %v131_v59  ;;  %v143_v2 = vand.u32 2147483648, %v131_v59  ;;  %v141_v5 = vand.u32 2147483647, %v131_v59  ;;  %vm137_vm7 = vweird.f32 %v131_v59 }
 0x1ad   :  { %v121_v8 = vmul.f32 %v120_v3, %v108_v36 }
 0x1ae   :  { %v144_v7 = vor.u32 1.1754944e-38, %v143_v2  ;;  %vm142_vm9 = vcmp.eq.f32.partialorder %v141_v5, 8.507059e+37 }
 0x1b2   :  { %v253_v62 = vpop.eup %252 }
 0x1b3   :  { %v133_v0 = vmul.f32 %v253_v62, %v131_v59  ;;  %vm138_vm6 = vweird.f32 %v253_v62 }
 0x1b4   :  { %vm139_vm8 = vmor %vm137_vm7, %vm138_vm6 }
 0x1b5   :  { %v134_v1 = vsub.f32 1.0, %v133_v0 }
 0x1b7   :  { %v135_v4 = vmul.f32 %v253_v62, %v134_v1 }
 0x1b9   :  { %v136_v6 = vadd.f32 %v253_v62, %v135_v4 }
 0x1bb   :  { %v140_v9 = vsel %vm139_vm8, %v253_v62, %v136_v6 }
 0x1bc   :  { %v145_v10 = vsel %vm142_vm9, %v144_v7, %v140_v9 }
 0x1bd   :  { %v146_v11 = vmul.f32 %v145_v10, %v121_v8 }
 0x1bf   :  { %v219_v12 = vclamps-f32 %v146_v11, 1.0 }
 0x1c1   :  { %v149_v14 = vadd.f32 1.0, %v219_v12 }
 0x1c3   :  { %v150_v15 = vmul.f32 %v149_v14, %v107_v13 }
 0x1c5   :  { %v151_v16 = vpack.c.bf16 %v150_v15, %v150_v15 }
 0x1c7   :  { %236 = vmatmul.msk.bf16.vlgmr.msra.gmra.mxu1 %vm188_vm10, %v151_v16 }
 0x244   :  { %v201_v18 = vpop.f32.mrf.mxu1 }
 0x245   :  { %v202_v19 = vadd.f32 %v247_v17, %v201_v18 }
 0x247   :  { %205 = vst [vmem:[%s340_s7] sm:$0x3f] %v202_v19 }
 0x24c   :  { %v203_v20 = vpop.f32.mrf.mxu1 }

// kernel: icl_forward.9
= control target key start
LH: loop header
LB: loop body
LE: loop exit
PB: predicated region body
PF: predicated region fallthrough
CT: control target
= control target key end

     0   :  { %s2440_s21 = smov 0   ;;  %s2442_s22 = smov 0   ;;  %s2721_s0 = inlined_call_operand.vmem [shape: bf16[2,4,16,8], index: 0, kind: input, shape index: {}]   ;;  %s2722_s1 = inlined_call_operand.vmem [shape: bf16[2,4,128,8], index: 1, kind: input, shape index: {}]   ;;  %s2723_s2 = inlined_call_operand.vmem [shape: bf16[2,4,128,8], index: 2, kind: input, shape index: {}]   ;;  %s2724_s3 = inlined_call_operand.vmem [shape: bf16[2,16,32], index: 3, kind: input, shape index: {}]   ;;  %s2725_s4 = inlined_call_operand.vmem [shape: bf16[4,8,32], index: 4, kind: input, shape index: {}]   ;;  %s2726_s5 = inlined_call_operand.vmem [shape: f32[1,32], index: 5, kind: input, shape index: {}]   ;;  %s2727_s6 = inlined_call_operand.vmem [shape: f32[1,32], index: 6, kind: input, shape index: {}]   ;;  %s2728_s7 = inlined_call_operand.vmem [shape: f32[1,32], index: 7, kind: input, shape index: {}]   ;;  %s2729_s8 = inlined_call_operand.vmem [shape: bf16[32,64], index: 8, kind: input, shape index: {}]   ;;  %s2730_s9 = inlined_call_operand.vmem [shape: f32[1,64], index: 9, kind: input, shape index: {}]   ;;  %s2731_s10 = inlined_call_operand.vmem [shape: bf16[64,32], index: 10, kind: input, shape index: {}]   ;;  %s2732_s11 = inlined_call_operand.vmem [shape: f32[1,32], index: 11, kind: input, shape index: {}]   ;;  %s2733_s12 = inlined_call_operand.vmem [shape: bf16[2,16,32], index: 12, kind: output, shape index: {}]  }
   0x1   :  { %s2444_s23 = smov 0  }
   0x2 LB: > { %s34_s24 = sadd.s32 1, %s2368_s22  ;;  %p1871_p0 = scmp.ge.s32.totalorder %s2372_s23, 1  ;;  %s2372_s23 = sphi %s2444_s23, %s22_s23   ;;  %s2368_s22 = sphi %s2442_s22, %s2735_s22   ;;  %s2364_s21 = sphi %s2440_s21, %s2734_s21  }
   0x3   : > { %p36_p1 = scmp.ge.s32.totalorder %s34_s24, 2  ;;  %p420_p2 = scmp.lt.s32.totalorder %s2372_s23, 3 }
   0x5   : > { %s2737_s24 = smov (%p36_p1, %s34_s24), 0  ;;  %p421_p3 = pnand %p1871_p0, %p420_p2 }
   0x6   : > { %p490_p4 = scmp.lt.s32.totalorder (!%p421_p3), %s2364_s21, 1 }
   0x7   : > { %424 = sbr.rel (%p421_p3) target bundleno = 1247 (0x4df), region = 68 }
   0xc   : > { %s2739_s21 = smov (!%p490_p4, %s2364_s21), 1  ;;  %vm711_vm0 = vcmask 64512   ;;  %vm1384_vm2 = vcmask 1043456   ;;  %vm1486_vm3 = vcmask 261120  }
   0xd   : > { %s2196_s25 = sshll.u32 %s2739_s21, 8  ;;  %s2195_s29 = sshll.u32 %s2739_s21, 5 }
   0xe   : > { %s2466_s28 = scalar_lea.vmem %s2722_s1, %s2196_s25  ;;  %s497_s14 = scalar_lea.vmem %s2721_s0, %s2195_s29 }
   0xf   : > { %v2211_v0 = vld [vmem:[%s2466_s28 + $0x38] sm:$0xff]  ;;  %v2210_v8 = vld [vmem:[%s2466_s28 + $0x30] sm:$0xff]  ;;  %v2209_v16 = vld [vmem:[%s2466_s28 + $0x28] sm:$0xff]  ;;  %s2545_s17 = scalar_lea.vmem %s2723_s2, %s2196_s25  ;;  %s2198_s30 = sshll.u32 %s2739_s21, 3 }
  0x10   : > { %v2227_v1 = vld [vmem:[%s2466_s28 + $0xb8] sm:$0xff]  ;;  %v737_v4 = vsel %vm711_vm0, %v2211_v0, 0  ;;  %v2226_v9 = vld [vmem:[%s2466_s28 + $0xb0] sm:$0xff]  ;;  %v734_v12 = vsel %vm711_vm0, %v2210_v8, 0  ;;  %v2225_v17 = vld [vmem:[%s2466_s28 + $0xa8] sm:$0xff]  ;;  %v731_v20 = vsel %vm711_vm0, %v2209_v16, 0  ;;  %s517_s15 = scalar_lea.vmem %s2724_s3, %s2198_s30 }
  0x11   : > { %v2235_v2 = vld [vmem:[%s2466_s28 + $0xf8] sm:$0xff]  ;;  %v909_v5 = vsel %vm711_vm0, %v2227_v1, 0  ;;  %739 = vmatpush.bf16.xpose.msra.mxu0 %v737_v4  ;;  %v2234_v10 = vld [vmem:[%s2466_s28 + $0xf0] sm:$0xff]  ;;  %v906_v13 = vsel %vm711_vm0, %v2226_v9, 0  ;;  %v2233_v18 = vld [vmem:[%s2466_s28 + $0xe8] sm:$0xff]  ;;  %v903_v21 = vsel %vm711_vm0, %v2225_v17, 0  ;;  %v1011_v4 = vlaneseq }
  0x12   : > { %v2219_v3 = vld [vmem:[%s2466_s28 + $0x78] sm:$0xff]  ;;  %v995_v6 = vsel %vm711_vm0, %v2235_v2, 0  ;;  %911 = vmatpush.bf16.xpose.msra.mxu2 %v909_v5  ;;  %v2218_v11 = vld [vmem:[%s2466_s28 + $0x70] sm:$0xff]  ;;  %v992_v14 = vsel %vm711_vm0, %v2234_v10, 0  ;;  %v2217_v19 = vld [vmem:[%s2466_s28 + $0x68] sm:$0xff]  ;;  %v989_v22 = vsel %vm711_vm0, %v2233_v18, 0 }
  0x13   : > { %v823_v7 = vsel %vm711_vm0, %v2219_v3, 0  ;;  %997 = vmatpush.bf16.xpose.msra.mxu3 %v995_v6  ;;  %v820_v15 = vsel %vm711_vm0, %v2218_v11, 0  ;;  %v817_v23 = vsel %vm711_vm0, %v2217_v19, 0  ;;  %v2208_v24 = vld [vmem:[%s2466_s28 + $0x20] sm:$0xff]  ;;  %v2207_v32 = vld [vmem:[%s2466_s28 + $0x18] sm:$0xff]  ;;  %v2206_v40 = vld [vmem:[%s2466_s28 + $0x10] sm:$0xff] }
  0x14   : > { %825 = vmatpush.bf16.xpose.msra.mxu1 %v823_v7  ;;  %v2224_v25 = vld [vmem:[%s2466_s28 + $0xa0] sm:$0xff]  ;;  %v728_v28 = vsel %vm711_vm0, %v2208_v24, 0  ;;  %v2223_v33 = vld [vmem:[%s2466_s28 + $0x98] sm:$0xff]  ;;  %v725_v36 = vsel %vm711_vm0, %v2207_v32, 0  ;;  %v2222_v41 = vld [vmem:[%s2466_s28 + $0x90] sm:$0xff]  ;;  %v722_v44 = vsel %vm711_vm0, %v2206_v40, 0 }
  0x15   : > { %v2232_v26 = vld [vmem:[%s2466_s28 + $0xe0] sm:$0xff]  ;;  %v900_v29 = vsel %vm711_vm0, %v2224_v25, 0  ;;  %v2231_v34 = vld [vmem:[%s2466_s28 + $0xd8] sm:$0xff]  ;;  %v897_v37 = vsel %vm711_vm0, %v2223_v33, 0  ;;  %v2230_v42 = vld [vmem:[%s2466_s28 + $0xd0] sm:$0xff]  ;;  %v894_v45 = vsel %vm711_vm0, %v2222_v41, 0 }
  0x16   : > { %v2216_v27 = vld [vmem:[%s2466_s28 + $0x60] sm:$0xff]  ;;  %v986_v30 = vsel %vm711_vm0, %v2232_v26, 0  ;;  %v2215_v35 = vld [vmem:[%s2466_s28 + $0x58] sm:$0xff]  ;;  %v983_v38 = vsel %vm711_vm0, %v2231_v34, 0  ;;  %v2214_v43 = vld [vmem:[%s2466_s28 + $0x50] sm:$0xff]  ;;  %v980_v46 = vsel %vm711_vm0, %v2230_v42, 0 }
  0x17   : > { %v814_v31 = vsel %vm711_vm0, %v2216_v27, 0  ;;  %v811_v39 = vsel %vm711_vm0, %v2215_v35, 0  ;;  %v808_v47 = vsel %vm711_vm0, %v2214_v43, 0  ;;  %v2205_v48 = vld [vmem:[%s2466_s28 + $0x8] sm:$0xff]  ;;  %v2204_v56 = vld [vmem:[%s2466_s28] sm:$0xff]  ;;  %v2202_v1 = vld [vmem:[%s497_s14 + $0x10] sm:$0xff] }
  0x18   : > { %v2221_v49 = vld [vmem:[%s2466_s28 + $0x88] sm:$0xff]  ;;  %v719_v52 = vsel %vm711_vm0, %v2205_v48, 0  ;;  %v2220_v57 = vld [vmem:[%s2466_s28 + $0x80] sm:$0xff]  ;;  %v716_v60 = vsel %vm711_vm0, %v2204_v56, 0  ;;  %v2203_v2 = vld [vmem:[%s497_s14 + $0x18] sm:$0xff]  ;;  %v1012_v6 = vand.u32 127, %v1011_v4 }
  0x19   : > { %740 = vmatpush.bf16.xpose.msra.mxu0 %v734_v12  ;;  %v2229_v50 = vld [vmem:[%s2466_s28 + $0xc8] sm:$0xff]  ;;  %v891_v53 = vsel %vm711_vm0, %v2221_v49, 0  ;;  %v2228_v58 = vld [vmem:[%s2466_s28 + $0xc0] sm:$0xff]  ;;  %v888_v61 = vsel %vm711_vm0, %v2220_v57, 0  ;;  %v2243_v5 = vld [vmem:[%s2545_s17 + $0x38] sm:$0xff] }
  0x1a   : > { %912 = vmatpush.bf16.xpose.msra.mxu2 %v906_v13  ;;  %v2213_v51 = vld [vmem:[%s2466_s28 + $0x48] sm:$0xff]  ;;  %v977_v54 = vsel %vm711_vm0, %v2229_v50, 0  ;;  %v2212_v59 = vld [vmem:[%s2466_s28 + $0x40] sm:$0xff]  ;;  %v974_v62 = vsel %vm711_vm0, %v2228_v58, 0  ;;  %v2242_v7 = vld [vmem:[%s2545_s17 + $0x30] sm:$0xff]  ;;  %vm1013_vm1 = vcmp.lt.s32.totalorder %v1012_v6, 5 }
  0x1b   : > { %998 = vmatpush.bf16.xpose.msra.mxu3 %v992_v14  ;;  %v805_v55 = vsel %vm711_vm0, %v2213_v51, 0  ;;  %v802_v63 = vsel %vm711_vm0, %v2212_v59, 0  ;;  %v2200_v0 = vld [vmem:[%s497_s14] sm:$0xff]  ;;  %v2201_v3 = vld [vmem:[%s497_s14 + $0x8] sm:$0xff]  ;;  %v2259_v24 = vld [vmem:[%s2545_s17 + $0xb8] sm:$0xff]  ;;  %s527_s14 = scalar_lea.vmem %s2733_s12, %s2198_s30 }
  0x1c   : > { %826 = vmatpush.bf16.xpose.msra.mxu1 %v820_v15  ;;  %v2267_v25 = vld [vmem:[%s2545_s17 + $0xf8] sm:$0xff]  ;;  %v2241_v26 = vld [vmem:[%s2545_s17 + $0x28] sm:$0xff]  ;;  %v2258_v27 = vld [vmem:[%s2545_s17 + $0xb0] sm:$0xff] }
  0x1d   : > { %v2265_v32 = vld [vmem:[%s2545_s17 + $0xe8] sm:$0xff]  ;;  %v2239_v33 = vld [vmem:[%s2545_s17 + $0x18] sm:$0xff]  ;;  %v2250_v34 = vld [vmem:[%s2545_s17 + $0x70] sm:$0xff] }
  0x1e   : > { %v2256_v35 = vld [vmem:[%s2545_s17 + $0xa0] sm:$0xff]  ;;  %v2263_v40 = vld [vmem:[%s2545_s17 + $0xd8] sm:$0xff]  ;;  %v2237_v41 = vld [vmem:[%s2545_s17 + $0x8] sm:$0xff] }
  0x1f   : > { %v2248_v42 = vld [vmem:[%s2545_s17 + $0x60] sm:$0xff]  ;;  %v2254_v43 = vld [vmem:[%s2545_s17 + $0x90] sm:$0xff]  ;;  %v2261_v48 = vld [vmem:[%s2545_s17 + $0xc8] sm:$0xff] }
  0x20   : > { %v2246_v49 = vld [vmem:[%s2545_s17 + $0x50] sm:$0xff]  ;;  %v2252_v50 = vld [vmem:[%s2545_s17 + $0x80] sm:$0xff] }
  0x21   : > { %741 = vmatpush.bf16.xpose.msra.mxu0 %v731_v20  ;;  %v2260_v51 = vld [vmem:[%s2545_s17 + $0xc0] sm:$0xff] }
  0x22   : > { %913 = vmatpush.bf16.xpose.msra.mxu2 %v903_v21  ;;  %v2244_v56 = vld [vmem:[%s2545_s17 + $0x40] sm:$0xff] }
  0x23   : > { %999 = vmatpush.bf16.xpose.msra.mxu3 %v989_v22 }
  0x24   : > { %827 = vmatpush.bf16.xpose.msra.mxu1 %v817_v23 }
  0x29   : > { %742 = vmatpush.bf16.xpose.msra.mxu0 %v728_v28  ;;  %v2266_v28 = vld [vmem:[%s2545_s17 + $0xf0] sm:$0xff] }
  0x2a   : > { %914 = vmatpush.bf16.xpose.msra.mxu2 %v900_v29  ;;  %v2240_v29 = vld [vmem:[%s2545_s17 + $0x20] sm:$0xff] }
  0x2b   : > { %1000 = vmatpush.bf16.xpose.msra.mxu3 %v986_v30  ;;  %v2251_v30 = vld [vmem:[%s2545_s17 + $0x78] sm:$0xff] }
  0x2c   : > { %828 = vmatpush.bf16.xpose.msra.mxu1 %v814_v31  ;;  %v2257_v31 = vld [vmem:[%s2545_s17 + $0xa8] sm:$0xff] }
  0x31   : > { %743 = vmatpush.bf16.xpose.msra.mxu0 %v725_v36  ;;  %v2264_v36 = vld [vmem:[%s2545_s17 + $0xe0] sm:$0xff] }
  0x32   : > { %915 = vmatpush.bf16.xpose.msra.mxu2 %v897_v37  ;;  %v2238_v37 = vld [vmem:[%s2545_s17 + $0x10] sm:$0xff] }
  0x33   : > { %1001 = vmatpush.bf16.xpose.msra.mxu3 %v983_v38  ;;  %v2249_v38 = vld [vmem:[%s2545_s17 + $0x68] sm:$0xff] }
  0x34   : > { %829 = vmatpush.bf16.xpose.msra.mxu1 %v811_v39  ;;  %v2255_v39 = vld [vmem:[%s2545_s17 + $0x98] sm:$0xff] }
  0x39   : > { %744 = vmatpush.bf16.xpose.msra.mxu0 %v722_v44  ;;  %v2262_v44 = vld [vmem:[%s2545_s17 + $0xd0] sm:$0xff] }
  0x3a   : > { %916 = vmatpush.bf16.xpose.msra.mxu2 %v894_v45  ;;  %v2236_v45 = vld [vmem:[%s2545_s17] sm:$0xff] }
  0x3b   : > { %1002 = vmatpush.bf16.xpose.msra.mxu3 %v980_v46  ;;  %v2247_v46 = vld [vmem:[%s2545_s17 + $0x58] sm:$0xff] }
  0x3c   : > { %830 = vmatpush.bf16.xpose.msra.mxu1 %v808_v47  ;;  %v2253_v47 = vld [vmem:[%s2545_s17 + $0x88] sm:$0xff] }
  0x41   : > { %745 = vmatpush.bf16.xpose.msra.mxu0 %v719_v52 }
  0x42   : > { %917 = vmatpush.bf16.xpose.msra.mxu2 %v891_v53  ;;  %v2245_v53 = vld [vmem:[%s2545_s17 + $0x48] sm:$0xff] }
  0x43   : > { %1003 = vmatpush.bf16.xpose.msra.mxu3 %v977_v54 }
  0x44   : > { %831 = vmatpush.bf16.xpose.msra.mxu1 %v805_v55 }
  0x49   : > { %746 = vmatpush.bf16.xpose.msra.mxu0 %v716_v60 }
  0x4a   : > { %918 = vmatpush.bf16.xpose.msra.mxu2 %v888_v61 }
  0x4b   : > { %1004 = vmatpush.bf16.xpose.msra.mxu3 %v974_v62 }
  0x4c   : > { %832 = vmatpush.bf16.xpose.msra.mxu1 %v802_v63 }
  0x50   : > { %1918 = vmatmul.msk.bf16.vlgmr.msra.gmra.mxu0 %vm711_vm0, %v2200_v0 }
  0x51   : > { %1992 = vmatmul.msk.bf16.vlgmr.msra.gmra.mxu2 %vm711_vm0, %v2202_v1  ;;  %1142 = vmatpush.bf16.msrb.mxu0 %v2243_v5 }
  0x52   : > { %2029 = vmatmul.msk.bf16.vlgmr.msra.gmra.mxu3 %vm711_vm0, %v2203_v2  ;;  %1278 = vmatpush.bf16.msrb.mxu2 %v2259_v24 }
  0x53   : > { %1955 = vmatmul.msk.bf16.vlgmr.msra.gmra.mxu1 %vm711_vm0, %v2201_v3  ;;  %1346 = vmatpush.bf16.msrb.mxu3 %v2267_v25 }
  0x54   : > { %1210 = vmatpush.bf16.msrb.mxu1 %v2251_v30 }
  0x55   : > { %1143 = vmatpush.bf16.msrb.mxu0 %v2242_v7 }
  0x56   : > { %1279 = vmatpush.bf16.msrb.mxu2 %v2258_v27 }
  0x57   : > { %1347 = vmatpush.bf16.msrb.mxu3 %v2266_v28 }
  0x58   : > { %1211 = vmatpush.bf16.msrb.mxu1 %v2250_v34 }
  0x59   : > { %1144 = vmatpush.bf16.msrb.mxu0 %v2241_v26 }
  0x5a   : > { %1280 = vmatpush.bf16.msrb.mxu2 %v2257_v31 }
  0x5b   : > { %1348 = vmatpush.bf16.msrb.mxu3 %v2265_v32 }
  0x5c   : > { %1212 = vmatpush.bf16.msrb.mxu1 %v2249_v38 }
  0x5d   : > { %1145 = vmatpush.bf16.msrb.mxu0 %v2240_v29 }
  0x5e   : > { %1281 = vmatpush.bf16.msrb.mxu2 %v2256_v35 }
  0x5f   : > { %1349 = vmatpush.bf16.msrb.mxu3 %v2264_v36 }
  0x60   : > { %1213 = vmatpush.bf16.msrb.mxu1 %v2248_v42  ;;  %v1377_v42 = vld [vmem:[%s2725_s4] sm:$0xf] }
  0x61   : > { %1146 = vmatpush.bf16.msrb.mxu0 %v2239_v33 }
  0x62   : > { %1282 = vmatpush.bf16.msrb.mxu2 %v2255_v39 }
  0x63   : > { %1350 = vmatpush.bf16.msrb.mxu3 %v2263_v40 }
  0x64   : > { %1214 = vmatpush.bf16.msrb.mxu1 %v2247_v46 }
  0x65   : > { %1147 = vmatpush.bf16.msrb.mxu0 %v2238_v37 }
  0x66   : > { %1283 = vmatpush.bf16.msrb.mxu2 %v2254_v43  ;;  %v2161_v43 = vld [vmem:[%s2725_s4 + $0x8] sm:$0xf] }
  0x67   : > { %1351 = vmatpush.bf16.msrb.mxu3 %v2262_v44  ;;  %v1406_v44 = vsel %vm1384_vm2, %v1377_v42, 0  ;;  %v1429_v46 = vsel %vm1384_vm2, %v2161_v43, 0 }
  0x68   : > { %1215 = vmatpush.bf16.msrb.mxu1 %v2246_v49 }
  0x69   : > { %1148 = vmatpush.bf16.msrb.mxu0 %v2237_v41 }
  0x6a   : > { %1284 = vmatpush.bf16.msrb.mxu2 %v2253_v47 }
  0x6b   : > { %1352 = vmatpush.bf16.msrb.mxu3 %v2261_v48  ;;  %v2158_v48 = vld [vmem:[%s2725_s4 + $0x4] sm:$0xf] }
  0x6c   : > { %1216 = vmatpush.bf16.msrb.mxu1 %v2245_v53  ;;  %v1386_v49 = vsel %vm1384_vm2, %v2158_v48, 0 }
  0x6d   : > { %1149 = vmatpush.bf16.msrb.mxu0 %v2236_v45  ;;  %v2163_v45 = vld [vmem:[%s2725_s4 + $0xc] sm:$0xf] }
  0x6e   : > { %1285 = vmatpush.bf16.msrb.mxu2 %v2252_v50  ;;  %v1454_v47 = vsel %vm1384_vm2, %v2163_v45, 0 }
  0x6f   : > { %1353 = vmatpush.bf16.msrb.mxu3 %v2260_v51 }
  0x70   : > { %1217 = vmatpush.bf16.msrb.mxu1 %v2244_v56 }
  0x71   : > { %1395 = vmatpush.bf16.msra.mxu0 %v1386_v49 }
  0x72   : > { %1438 = vmatpush.bf16.msra.mxu2 %v1429_v46  ;;  %v2374_v46 = vmov 32.0  }
  0x73   : > { %1463 = vmatpush.bf16.msra.mxu3 %v1454_v47 }
  0x74   : > { %1415 = vmatpush.bf16.msra.mxu1 %v1406_v44 }
  0xcd   : > { %v748_v8 = vpop.f32.mrf.mxu0 }
  0xce   : > { %v2550_v9 = vsel %vm1013_vm1, %v748_v8, -1e+30 }
  0xcf   : > { %1024 = vmax.xlane.f32.xlu2 %v2550_v9 }
  0xd0   : > { %v834_v16 = vpop.f32.mrf.mxu1 }
  0xd1   : > { %v2574_v22 = vsel %vm1013_vm1, %v834_v16, -1e+30 }
  0xd4   : > { %v920_v10 = vpop.f32.mrf.mxu2 }
  0xd5   : > { %v1006_v11 = vpop.f32.mrf.mxu3  ;;  %v2554_v12 = vsel %vm1013_vm1, %v920_v10, -1e+30  ;;  %v750_v14 = vpop.f32.mrf.mxu0 }
  0xd6   : > { %v2557_v13 = vsel %vm1013_vm1, %v1006_v11, -1e+30  ;;  %1032 = vmax.xlane.f32.xlu0 %v2554_v12  ;;  %v2562_v15 = vsel %vm1013_vm1, %v750_v14, -1e+30 }
  0xd7   : > { %1036 = vmax.xlane.f32.xlu1 %v2557_v13  ;;  %1026 = vmax.xlane.f32.xlu2 %v2562_v15 }
  0xd8   : > { %v836_v21 = vpop.f32.mrf.mxu1 }
  0xd9   : > { %v2578_v23 = vsel %vm1013_vm1, %v836_v21, -1e+30 }
  0xdc   : > { %v922_v17 = vpop.f32.mrf.mxu2 }
  0xdd   : > { %v1008_v18 = vpop.f32.mrf.mxu3  ;;  %v2566_v19 = vsel %vm1013_vm1, %v922_v17, -1e+30 }
  0xde   : > { %v2569_v20 = vsel %vm1013_vm1, %v1008_v18, -1e+30  ;;  %1034 = vmax.xlane.f32.xlu0 %v2566_v19 }
  0xdf   : > { %1038 = vmax.xlane.f32.xlu1 %v2569_v20 }
  0xe6   : > { %1028 = vmax.xlane.f32.xlu0 %v2574_v22 }
  0xe7   : > { %1030 = vmax.xlane.f32.xlu1 %v2578_v23 }
 0x142   : > { %v1025_v52 = vpop.xlane.xlu2 %1024 }
 0x143   : > { %v1040_v54 = vsub.f32 %v2550_v9, %v1025_v52 }
 0x145   : > { %v1048_v55 = vmul.f32 1.442695, %v1040_v54 }
 0x147   : > { %2308 = vpow2.f32 %v1048_v55 }
 0x149   : > { %v1033_v57 = vpop.xlane.xlu0 %1032 }
 0x14a   : > { %v1037_v58 = vpop.xlane.xlu1 %1036  ;;  %v1044_v59 = vsub.f32 %v2554_v12, %v1033_v57  ;;  %v1027_v61 = vpop.xlane.xlu2 %1026 }
 0x14b   : > { %v1046_v60 = vsub.f32 %v2557_v13, %v1037_v58  ;;  %v1041_v63 = vsub.f32 %v2562_v15, %v1027_v61 }
 0x14c   : > { %v1056_v62 = vmul.f32 1.442695, %v1044_v59 }
 0x14d   : > { %v1060_v0 = vmul.f32 1.442695, %v1046_v60  ;;  %v2309_v1 = vpop.eup %2308  ;;  %v1050_v2 = vmul.f32 1.442695, %v1041_v63 }
 0x14e   : > { %2310 = vpow2.f32 %v1056_v62  ;;  %1064 = vadd.xlane.f32.xlu0 %v2309_v1  ;;  %v1080_v11 = vpack.c.bf16 %v2309_v1, %v2309_v1 }
 0x14f   : > { %2312 = vpow2.f32 %v1060_v0 }
 0x150   : > { %2314 = vpow2.f32 %v1050_v2  ;;  %v1090_v15 = vunpack.c.l.b16 %v1080_v11 }
 0x151   : > { %v1035_v3 = vpop.xlane.xlu0 %1034 }
 0x152   : > { %v1039_v4 = vpop.xlane.xlu1 %1038  ;;  %v1045_v5 = vsub.f32 %v2566_v19, %v1035_v3 }
 0x153   : > { %v1047_v6 = vsub.f32 %v2569_v20, %v1039_v4 }
 0x154   : > { %v2311_v7 = vpop.eup %2310  ;;  %v1058_v8 = vmul.f32 1.442695, %v1045_v5 }
 0x155   : > { %v2313_v9 = vpop.eup %2312  ;;  %v1062_v10 = vmul.f32 1.442695, %v1047_v6  ;;  %1072 = vadd.xlane.f32.xlu2 %v2311_v7  ;;  %v1084_v21 = vpack.c.bf16 %v2311_v7, %v2311_v7 }
 0x156   : > { %v2315_v12 = vpop.eup %2314  ;;  %2316 = vpow2.f32 %v1058_v8  ;;  %1076 = vadd.xlane.f32.xlu1 %v2313_v9  ;;  %v1086_v26 = vpack.c.bf16 %v2313_v9, %v2313_v9 }
 0x157   : > { %2318 = vpow2.f32 %v1062_v10  ;;  %v1081_v13 = vpack.c.bf16 %v2315_v12, %v2315_v12  ;;  %v1226_v31 = vunpack.c.l.b16 %v1084_v21 }
 0x158   : > { %v1294_v32 = vunpack.c.l.b16 %v1086_v26  ;;  %v2275_v26 = vld [vmem:[%s517_s15] sm:$0xff]  }
 0x159   : > { %v1029_v14 = vpop.xlane.xlu0 %1028  ;;  %v1091_v16 = vunpack.c.l.b16 %v1081_v13 }
 0x15a   : > { %v1042_v17 = vsub.f32 %v2574_v22, %v1029_v14  ;;  %v1031_v18 = vpop.xlane.xlu1 %1030 }
 0x15b   : > { %v1043_v19 = vsub.f32 %v2578_v23, %v1031_v18  ;;  %v1092_v20 = vpack.c.b16 %v1091_v16, %v1090_v15 }
 0x15c   : > { %v2317_v24 = vpop.eup %2316  ;;  %v1052_v25 = vmul.f32 1.442695, %v1042_v17 }
 0x15d   : > { %v2319_v27 = vpop.eup %2318  ;;  %v1054_v28 = vmul.f32 1.442695, %v1043_v19  ;;  %1074 = vadd.xlane.f32.xlu0 %v2317_v24  ;;  %1150 = vmatmul.bf16.vlgmr.msrb.gmra.mxu0 %v1092_v20  ;;  %v1085_v29 = vpack.c.bf16 %v2317_v24, %v2317_v24 }
 0x15e   : > { %2320 = vpow2.f32 %v1052_v25  ;;  %1078 = vadd.xlane.f32.xlu2 %v2319_v27  ;;  %1066 = vadd.xlane.f32.xlu1 %v2315_v12  ;;  %v1087_v30 = vpack.c.bf16 %v2319_v27, %v2319_v27 }
 0x15f   : > { %2322 = vpow2.f32 %v1054_v28  ;;  %v1227_v22 = vunpack.c.l.b16 %v1085_v29 }
 0x160   : > { %v1295_v33 = vunpack.c.l.b16 %v1087_v30 }
 0x161   : > { %v1228_v23 = vpack.c.b16 %v1227_v22, %v1226_v31  ;;  %v2276_v31 = vunpack.c.l.bf16 %v2275_v26 }
 0x162   : > { %v1296_v34 = vpack.c.b16 %v1295_v33, %v1294_v32  ;;  %v2303_v32 = vld [vmem:[%s2726_s5] ss:$0 sm:$0xff] }
 0x163   : > { %1286 = vmatmul.bf16.vlgmr.msrb.gmra.mxu2 %v1228_v23 }
 0x164   : > { %v2321_v35 = vpop.eup %2320  ;;  %1354 = vmatmul.bf16.vlgmr.msrb.gmra.mxu3 %v1296_v34 }
 0x165   : > { %v2323_v36 = vpop.eup %2322  ;;  %v1082_v37 = vpack.c.bf16 %v2321_v35, %v2321_v35 }
 0x166   : > { %1070 = vadd.xlane.f32.xlu0 %v2323_v36  ;;  %1068 = vadd.xlane.f32.xlu2 %v2321_v35  ;;  %v1083_v38 = vpack.c.bf16 %v2323_v36, %v2323_v36 }
 0x167   : > { %v1158_v39 = vunpack.c.l.b16 %v1082_v37 }
 0x168   : > { %v1159_v40 = vunpack.c.l.b16 %v1083_v38 }
 0x16a   : > { %v1160_v41 = vpack.c.b16 %v1159_v40, %v1158_v39  ;;  %v2277_v39 = vunpack.c.h.bf16 %v2275_v26 }
 0x16c   : > { %1218 = vmatmul.bf16.vlgmr.msrb.gmra.mxu1 %v1160_v41 }
 0x1c1   : > { %v1065_v52 = vpop.xlane.xlu0 %1064 }
 0x1c2   : > { %2324 = vrcp.f32 %v1065_v52 }
 0x1c8   : > { %v1073_v51 = vpop.xlane.xlu2 %1072  ;;  %v2325_v57 = vpop.eup %2324 }
 0x1c9   : > { %v1077_v50 = vpop.xlane.xlu1 %1076 }
 0x1d0   : > { %v1075_v55 = vpop.xlane.xlu0 %1074 }
 0x1d1   : > { %v1067_v53 = vpop.xlane.xlu1 %1066  ;;  %v1079_v56 = vpop.xlane.xlu2 %1078 }
 0x1d2   : > { %2326 = vrcp.f32 %v1067_v53 }
 0x1d3   : > { %2328 = vrcp.f32 %v1073_v51 }
 0x1d4   : > { %2330 = vrcp.f32 %v1077_v50 }
 0x1d5   : > { %2332 = vrcp.f32 %v1075_v55 }
 0x1d6   : > { %2334 = vrcp.f32 %v1079_v56 }
 0x1d8   : > { %v2327_v58 = vpop.eup %2326 }
 0x1d9   : > { %v1071_v0 = vpop.xlane.xlu0 %1070  ;;  %v1069_v2 = vpop.xlane.xlu2 %1068 }
 0x1da   : > { %v1151_v54 = vpop.f32.mrf.mxu0  ;;  %2336 = vrcp.f32 %v1071_v0  ;;  %v2329_v4 = vpop.eup %2328  ;;  %v2269_v0 = vld [vmem:[%s2729_s8 + $0x8] sm:$0xff] }
 0x1db   : > { %v1368_v60 = vmul.f32 %v2325_v57, %v1151_v54  ;;  %2338 = vrcp.f32 %v1069_v2  ;;  %v2331_v5 = vpop.eup %2330  ;;  %1578 = vmatpush.bf16.msrb.mxu0 %v2269_v0 }
 0x1dc   : > { %v2333_v6 = vpop.eup %2332  ;;  %2340 = vrcp.f32 %v2374_v46 }
 0x1dd   : > { %v2335_v8 = vpop.eup %2334 }
 0x1e0   : > { %v2337_v12 = vpop.eup %2336 }
 0x1e1   : > { %v2339_v15 = vpop.eup %2338 }
 0x1e2   : > { %v1153_v59 = vpop.f32.mrf.mxu0  ;;  %v2341_v47 = vpop.eup %2340 }
 0x1e3   : > { %v1369_v61 = vmul.f32 %v2327_v58, %v1153_v59  ;;  %v1494_v48 = vmul.f32 32.0, %v2341_v47  ;;  %vm1498_vm4 = vweird.f32 %v2341_v47 }
 0x1e5   : > { %v1376_v62 = vpack.c.bf16 %v1369_v61, %v1368_v60  ;;  %v1495_v49 = vsub.f32 1.0, %v1494_v48 }
 0x1e6   : > { %v1287_v63 = vpop.f32.mrf.mxu2 }
 0x1e7   : > { %v1355_v1 = vpop.f32.mrf.mxu3  ;;  %2160 = vmatmul.msk.bf16.vlgmr.msra.gmra.mxu1 %vm711_vm0, %v1376_v62  ;;  %v1372_v9 = vmul.f32 %v2329_v4, %v1287_v63  ;;  %v1496_v50 = vmul.f32 %v2341_v47, %v1495_v49 }
 0x1e8   : > { %v1374_v13 = vmul.f32 %v2331_v5, %v1355_v1 }
 0x1e9   : > { %v1219_v3 = vpop.f32.mrf.mxu1  ;;  %v1497_v51 = vadd.f32 %v2341_v47, %v1496_v50 }
 0x1ea   : > { %v1370_v18 = vmul.f32 %v2339_v15, %v1219_v3  ;;  %v2268_v3 = vld [vmem:[%s2729_s8] sm:$0xff] }
 0x1eb   : > { %v1499_v52 = vsel %vm1498_vm4, %v2341_v47, %v1497_v51  ;;  %1579 = vmatpush.bf16.msrb.mxu0 %v2268_v3  ;;  %v2273_v51 = vld [vmem:[%s2731_s10 + $0x18] sm:$0xff]  ;;  %v2271_v3 = vld [vmem:[%s2731_s10 + $0x8] sm:$0xff]  ;;  %vm1735_vm4 = vcmask 257024  }
 0x1ec   : > { %1715 = vmatpush.bf16.msrb.mxu1 %v2273_v51 }
 0x1ee   : > { %v1289_v7 = vpop.f32.mrf.mxu2 }
 0x1ef   : > { %v1373_v10 = vmul.f32 %v2333_v6, %v1289_v7  ;;  %v1357_v11 = vpop.f32.mrf.mxu3 }
 0x1f0   : > { %v1375_v14 = vmul.f32 %v2335_v8, %v1357_v11 }
 0x1f1   : > { %v1422_v16 = vpack.c.bf16 %v1373_v10, %v1372_v9  ;;  %v1221_v17 = vpop.f32.mrf.mxu1 }
 0x1f2   : > { %v1447_v19 = vpack.c.bf16 %v1375_v14, %v1374_v13  ;;  %v1371_v20 = vmul.f32 %v2337_v12, %v1221_v17 }
 0x1f3   : > { %2162 = vmatmul.msk.bf16.vlgmr.msra.gmra.mxu2 %vm711_vm0, %v1422_v16 }
 0x1f4   : > { %v1378_v21 = vpack.c.bf16 %v1371_v20, %v1370_v18  ;;  %2164 = vmatmul.msk.bf16.vlgmr.msra.gmra.mxu3 %vm711_vm0, %v1447_v19  ;;  %v2304_v19 = vld [vmem:[%s2727_s6] ss:$0 sm:$0xff] }
 0x1f6   : > { %2159 = vmatmul.msk.bf16.vlgmr.msra.gmra.mxu0 %vm711_vm0, %v1378_v21 }
 0x264   : > { %v1417_v24 = vpop.f32.mrf.mxu1 }
 0x26c   : > { %v1419_v34 = vpop.f32.mrf.mxu1 }
 0x273   : > { %v1397_v25 = vpop.f32.mrf.mxu0 }
 0x274   : > { %v1418_v27 = vadd.f32 %v1417_v24, %v1397_v25  ;;  %v2305_v25 = vld [vmem:[%s2728_s7] ss:$0 sm:$0xff] }
 0x276   : > { %v1440_v28 = vpop.f32.mrf.mxu2 }
 0x277   : > { %v1445_v29 = vadd.f32 %v1440_v28, %v1418_v27  ;;  %v1465_v30 = vpop.f32.mrf.mxu3 }
 0x279   : > { %v1470_v22 = vadd.f32 %v1465_v30, %v1445_v29 }
 0x27b   : > { %v1476_v33 = vadd.f32 %v2276_v31, %v1470_v22  ;;  %v1399_v23 = vpop.f32.mrf.mxu0  ;;  %v2306_v22 = vld [vmem:[%s2730_s9] ss:$0 sm:$0xff] }
 0x27c   : > { %v1420_v36 = vadd.f32 %v1419_v34, %v1399_v23 }
 0x27d   : > { %v2644_v35 = vadd.f32 %v2303_v32, %v1476_v33 }
 0x27e   : > { %v1442_v37 = vpop.f32.mrf.mxu2 }
 0x27f   : > { %v1446_v38 = vadd.f32 %v1442_v37, %v1420_v36  ;;  %v1487_v40 = vsel %vm1486_vm3, %v2644_v35, 0.0  ;;  %v1467_v41 = vpop.f32.mrf.mxu3 }
 0x280   : > { %1488 = vadd.xlane.f32.xlu1 %v1487_v40 }
 0x281   : > { %v1471_v42 = vadd.f32 %v1467_v41, %v1446_v38 }
 0x283   : > { %v1477_v43 = vadd.f32 %v2277_v39, %v1471_v42 }
 0x285   : > { %v2648_v44 = vadd.f32 %v2303_v32, %v1477_v43 }
 0x287   : > { %v1490_v45 = vsel %vm1486_vm3, %v2648_v44, 0.0 }
 0x288   : > { %1491 = vadd.xlane.f32.xlu2 %v1490_v45 }
 0x2f3   : > { %v1489_v53 = vpop.xlane.xlu1 %1488 }
 0x2f4   : > { %v1500_v54 = vmul.f32 %v1499_v52, %v1489_v53 }
 0x2f6   : > { %v1502_v55 = vsub.f32 %v2644_v35, %v1500_v54 }
 0x2f8   : > { %v1504_v56 = vmul.f32 %v1502_v55, %v1502_v55 }
 0x2fa   : > { %v1506_v57 = vsel %vm1486_vm3, %v1504_v56, 0.0 }
 0x2fb   : > { %1507 = vadd.xlane.f32.xlu0 %v1506_v57  ;;  %v1492_v58 = vpop.xlane.xlu2 %1491 }
 0x2fc   : > { %v1501_v59 = vmul.f32 %v1499_v52, %v1492_v58 }
 0x2fe   : > { %v1503_v60 = vsub.f32 %v2648_v44, %v1501_v59  ;;  %v2272_v59 = vld [vmem:[%s2731_s10 + $0x10] sm:$0xff] }
 0x2ff   : > { %1716 = vmatpush.bf16.msrb.mxu1 %v2272_v59 }
 0x300   : > { %v1505_v61 = vmul.f32 %v1503_v60, %v1503_v60 }
 0x302   : > { %v1509_v62 = vsel %vm1486_vm3, %v1505_v61, 0.0 }
 0x303   : > { %1510 = vadd.xlane.f32.xlu1 %v1509_v62  ;;  %1717 = vmatpush.bf16.msrb.mxu1 %v2271_v3 }
 0x36e   : > { %v1508_v63 = vpop.xlane.xlu0 %1507 }
 0x36f   : > { %v1512_v1 = vmul.f32 %v1508_v63, %v1499_v52 }
 0x371   : > { %v1514_v2 = vadd.f32 1e-05, %v1512_v1 }
 0x373   : > { %2342 = vrsqrt.f32 %v1514_v2  ;;  %vm1522_vm6 = vweird.f32 %v1514_v2 }
 0x376   : > { %v1511_v4 = vpop.xlane.xlu1 %1510 }
 0x377   : > { %v1513_v5 = vmul.f32 %v1511_v4, %v1499_v52 }
 0x379   : > { %v2343_v6 = vpop.eup %2342  ;;  %v1515_v7 = vadd.f32 1e-05, %v1513_v5 }
 0x37a   : > { %v1517_v8 = vmul.f32 %v2343_v6, %v1514_v2  ;;  %vm1523_vm5 = vweird.f32 %v2343_v6 }
 0x37b   : > { %2344 = vrsqrt.f32 %v1515_v7  ;;  %vm1524_vm7 = vmor %vm1522_vm6, %vm1523_vm5  ;;  %vm1532_vm9 = vweird.f32 %v1515_v7 }
 0x37c   : > { %v1518_v9 = vmul.f32 %v2343_v6, %v1517_v8 }
 0x37e   : > { %v1519_v10 = vmul.f32 0.5, %v1518_v9  ;;  %v2270_v9 = vld [vmem:[%s2731_s10] sm:$0xff] }
 0x37f   : > { %1718 = vmatpush.bf16.msrb.mxu1 %v2270_v9 }
 0x380   : > { %v1520_v11 = vsub.f32 1.5, %v1519_v10 }
 0x381   : > { %v2345_v12 = vpop.eup %2344 }
 0x382   : > { %v1521_v13 = vmul.f32 %v2343_v6, %v1520_v11  ;;  %v1527_v14 = vmul.f32 %v2345_v12, %v1515_v7  ;;  %vm1533_vm8 = vweird.f32 %v2345_v12 }
 0x383   : > { %vm1534_vm10 = vmor %vm1532_vm9, %vm1533_vm8 }
 0x384   : > { %v1528_v15 = vmul.f32 %v2345_v12, %v1527_v14  ;;  %v1525_v16 = vsel %vm1524_vm7, %v2343_v6, %v1521_v13 }
 0x385   : > { %v1536_v20 = vmul.f32 %v1525_v16, %v1502_v55 }
 0x386   : > { %v1529_v17 = vmul.f32 0.5, %v1528_v15 }
 0x387   : > { %v1541_v26 = vmul.f32 %v2304_v19, %v1536_v20 }
 0x388   : > { %v1530_v18 = vsub.f32 1.5, %v1529_v17 }
 0x389   : > { %v1546_v29 = vadd.f32 %v2305_v25, %v1541_v26 }
 0x38a   : > { %v1531_v21 = vmul.f32 %v2345_v12, %v1530_v18 }
 0x38c   : > { %v1535_v24 = vsel %vm1534_vm10, %v2345_v12, %v1531_v21 }
 0x38d   : > { %v1537_v27 = vmul.f32 %v1535_v24, %v1503_v60 }
 0x38f   : > { %v1542_v28 = vmul.f32 %v2304_v19, %v1537_v27 }
 0x391   : > { %v1547_v30 = vadd.f32 %v2305_v25, %v1542_v28 }
 0x393   : > { %v1548_v31 = vpack.c.bf16 %v1547_v30, %v1546_v29 }
 0x395   : > { %2173 = vmatmul.msk.bf16.vlgmr.msrb.gmra.mxu0 %vm1486_vm3, %v1548_v31  ;;  %vm1707_vm3 = vcmask 523264  }
 0x412   : > { %v1581_v32 = vpop.f32.mrf.mxu0 }
 0x413   : > { %v2672_v33 = vadd.f32 %v2306_v22, %v1581_v32 }
 0x415   : > { %v2675_v23 = vmul.f32 0.70710677, %v2672_v33 }
 0x417   : > { %v1590_v34 = vmul.f32 %v2675_v23, %v2675_v23 }
 0x419   : > { %v1591_v36 = vmin.f32 %v1590_v34, 16.0 }
 0x41a   : > { %v1583_v37 = vpop.f32.mrf.mxu0 }
 0x41b   : > { %v1592_v38 = vmul.f32 2.1237322e-06, %v1591_v36  ;;  %v1603_v39 = vmul.f32 3.8918573e-05, %v1591_v36  ;;  %v2679_v40 = vadd.f32 %v2306_v22, %v1583_v37 }
 0x41d   : > { %v1593_v41 = vadd.f32 0.00028619796, %v1592_v38  ;;  %v1604_v42 = vadd.f32 0.001143296, %v1603_v39  ;;  %v2682_v43 = vmul.f32 0.70710677, %v2679_v40 }
 0x41f   : > { %v1605_v45 = vmul.f32 %v1604_v42, %v1591_v36  ;;  %v1630_v46 = vmul.f32 %v2682_v43, %v2682_v43  ;;  %v1594_v47 = vmul.f32 %v1593_v41, %v1591_v36 }
 0x421   : > { %v1606_v48 = vadd.f32 0.014752088, %v1605_v45  ;;  %v1631_v49 = vmin.f32 %v1630_v46, 16.0  ;;  %v1595_v54 = vadd.f32 0.0036580483, %v1594_v47 }
 0x423   : > { %v1607_v50 = vmul.f32 %v1606_v48, %v1591_v36  ;;  %v1632_v52 = vmul.f32 2.1237322e-06, %v1631_v49  ;;  %v1643_v53 = vmul.f32 3.8918573e-05, %v1631_v49  ;;  %v1596_v62 = vmul.f32 %v1595_v54, %v1591_v36 }
 0x425   : > { %v1608_v55 = vadd.f32 0.112945676, %v1607_v50  ;;  %v1633_v56 = vadd.f32 0.00028619796, %v1632_v52  ;;  %v1644_v57 = vadd.f32 0.001143296, %v1643_v53 }
 0x426   : > { %v1597_v5 = vadd.f32 0.05243302, %v1596_v62 }
 0x427   : > { %v1609_v58 = vmul.f32 %v1608_v55, %v1591_v36  ;;  %v1634_v60 = vmul.f32 %v1633_v56, %v1631_v49  ;;  %v1645_v61 = vmul.f32 %v1644_v57, %v1631_v49  ;;  %v1586_v55 = vmul.f32 0.5, %v2672_v33 }
 0x428   : > { %v1598_v11 = vmul.f32 %v1597_v5, %v1591_v36  ;;  %v1587_v56 = vmul.f32 0.5, %v2679_v40 }
 0x429   : > { %v1610_v63 = vadd.f32 0.4994258, %v1609_v58  ;;  %v1635_v0 = vadd.f32 0.0036580483, %v1634_v60  ;;  %v1646_v1 = vadd.f32 0.014752088, %v1645_v61 }
 0x42a   : > { %v1599_v16 = vadd.f32 0.18741608, %v1598_v11 }
 0x42b   : > { %v1611_v2 = vmul.f32 %v1610_v63, %v1591_v36  ;;  %v1647_v4 = vmul.f32 %v1646_v1, %v1631_v49  ;;  %v1636_v7 = vmul.f32 %v1635_v0, %v1631_v49 }
 0x42c   : > { %v1600_v21 = vmul.f32 %v1599_v16, %v1591_v36 }
 0x42d   : > { %v1612_v6 = vadd.f32 1.0, %v1611_v2  ;;  %v1648_v8 = vadd.f32 0.112945676, %v1647_v4  ;;  %v1637_v12 = vadd.f32 0.05243302, %v1636_v7 }
 0x42e   : > { %v1601_v29 = vadd.f32 1.1283791, %v1600_v21 }
 0x42f   : > { %2346 = vrcp.f32 %v1612_v6  ;;  %v1649_v10 = vmul.f32 %v1648_v8, %v1631_v49  ;;  %v1638_v18 = vmul.f32 %v1637_v12, %v1631_v49  ;;  %v1624_v25 = vand.u32 2147483648, %v1612_v6 }
 0x430   : > { %v1622_v27 = vand.u32 2147483647, %v1612_v6  ;;  %vm1618_vm12 = vweird.f32 %v1612_v6  ;;  %v1602_v38 = vmul.f32 %v1601_v29, %v2675_v23 }
 0x431   : > { %v1650_v13 = vadd.f32 0.4994258, %v1649_v10  ;;  %v1639_v26 = vadd.f32 0.18741608, %v1638_v18  ;;  %v1625_v22 = vor.u32 1.1754944e-38, %v1624_v25 }
 0x432   : > { %vm1623_vm14 = vcmp.eq.f32.partialorder %v1622_v27, 8.507059e+37 }
 0x433   : > { %v1651_v14 = vmul.f32 %v1650_v13, %v1631_v49  ;;  %v1640_v32 = vmul.f32 %v1639_v26, %v1631_v49 }
 0x435   : > { %v2347_v15 = vpop.eup %2346  ;;  %v1652_v19 = vadd.f32 1.0, %v1651_v14  ;;  %v1641_v36 = vadd.f32 1.1283791, %v1640_v32 }
 0x436   : > { %v1614_v17 = vmul.f32 %v2347_v15, %v1612_v6  ;;  %vm1619_vm11 = vweird.f32 %v2347_v15 }
 0x437   : > { %2348 = vrcp.f32 %v1652_v19  ;;  %vm1620_vm13 = vmor %vm1618_vm12, %vm1619_vm11  ;;  %v1664_v41 = vand.u32 2147483648, %v1652_v19  ;;  %v1662_v46 = vand.u32 2147483647, %v1652_v19  ;;  %vm1658_vm0 = vweird.f32 %v1652_v19 }
 0x438   : > { %v1615_v20 = vsub.f32 1.0, %v1614_v17  ;;  %v1642_v51 = vmul.f32 %v1641_v36, %v2682_v43  ;;  %v2307_v43 = vld [vmem:[%s2732_s11] ss:$0 sm:$0xff] }
 0x439   : > { %v1665_v48 = vor.u32 1.1754944e-38, %v1664_v41  ;;  %vm1663_vm2 = vcmp.eq.f32.partialorder %v1662_v46, 8.507059e+37 }
 0x43a   : > { %v1616_v24 = vmul.f32 %v2347_v15, %v1615_v20 }
 0x43c   : > { %v1617_v28 = vadd.f32 %v2347_v15, %v1616_v24 }
 0x43d   : > { %v2349_v30 = vpop.eup %2348 }
 0x43e   : > { %v1621_v31 = vsel %vm1620_vm13, %v2347_v15, %v1617_v28  ;;  %v1654_v34 = vmul.f32 %v2349_v30, %v1652_v19  ;;  %vm1659_vm15 = vweird.f32 %v2349_v30 }
 0x43f   : > { %v1626_v37 = vsel %vm1623_vm14, %v1625_v22, %v1621_v31  ;;  %vm1660_vm1 = vmor %vm1658_vm0, %vm1659_vm15 }
 0x440   : > { %v1655_v39 = vsub.f32 1.0, %v1654_v34  ;;  %v1627_v42 = vmul.f32 %v1626_v37, %v1602_v38 }
 0x442   : > { %v1656_v45 = vmul.f32 %v2349_v30, %v1655_v39  ;;  %v2174_v50 = vclamps-f32 %v1627_v42, 1.0 }
 0x444   : > { %v1657_v47 = vadd.f32 %v2349_v30, %v1656_v45  ;;  %v1670_v23 = vadd.f32 1.0, %v2174_v50 }
 0x446   : > { %v1661_v49 = vsel %vm1660_vm1, %v2349_v30, %v1657_v47  ;;  %v1672_v58 = vmul.f32 %v1670_v23, %v1586_v55 }
 0x447   : > { %v1666_v52 = vsel %vm1663_vm2, %v1665_v48, %v1661_v49 }
 0x448   : > { %v1667_v53 = vmul.f32 %v1666_v52, %v1642_v51 }
 0x44a   : > { %v2175_v54 = vclamps-f32 %v1667_v53, 1.0 }
 0x44c   : > { %v1671_v57 = vadd.f32 1.0, %v2175_v54 }
 0x44e   : > { %v1673_v59 = vmul.f32 %v1671_v57, %v1587_v56 }
 0x450   : > { %v1674_v60 = vpack.c.bf16 %v1673_v59, %v1672_v58 }
 0x452   : > { %2192 = vmatmul.msk.bf16.vlgmr.msrb.gmra.mxu1 %vm1707_vm3, %v1674_v60 }
 0x4cf   : > { %v1720_v61 = vpop.f32.mrf.mxu1 }
 0x4d0   : > { %v1725_v62 = vadd.f32 %v1720_v61, %v2644_v35 }
 0x4d2   : > { %v1731_v63 = vadd.f32 %v2307_v43, %v1725_v62 }
 0x4d4   : > { %v1733_v33 = vpack.c.bf16 %v1731_v63, %v1731_v63 }
 0x4d6   : > { %1736 = vst.msk [vmem:[%s527_s14] sm:$0xf] %vm1735_vm4, %v1733_v33 }
 0x4d7   : > { %v1722_v40 = vpop.f32.mrf.mxu1 }
 0x4d8   : > { %v1726_v0 = vadd.f32 %v1722_v40, %v2648_v44 }
 0x4da   : > { %v1732_v1 = vadd.f32 %v2307_v43, %v1726_v0 }
 0x4dc   : > { %v1734_v2 = vpack.c.bf16 %v1732_v1, %v1732_v1 }
 0x4de   : > { %1737 = vst.msk [vmem:[%s527_s14 + $0x4] sm:$0xf] %vm1735_vm4, %v1734_v2 }
 0x4df PF: > { %s22_s23 = sadd.s32 1, %s2372_s23   ;;  %s2734_s21 = smov %s2368_s22 }
 0x4e0   : > { %p19_p5 = scmp.ge.s32.totalorder %s22_s23, 4   ;;  %s2735_s22 = smov %s2737_s24 }
 0x4e2   :  { %21 = sbr.rel (!%p19_p5) target bundleno = 2 (0x2), region = 110 }

</bundles_post_ra>
